<compile_context>
chip_gen: v7x
topology: tpu7x:2x2x1
jax: 0.10.0
libtpu: 0.0.40
codegen_flags: <defaults>
</compile_context>

<pallas_src>
import jax
import jax.numpy as jnp
import numpy as np
from jax import lax
from jax.experimental import pallas as pl
from jax.experimental.pallas import tpu as pltpu


def spawn_predictor_kernel(g0_ref,                        # (S, TB, 4H) precomputed x@Wih0^T + b0
                           whh0_ref,                      # (H, 4H)
                           wih1_ref, whh1_ref, b1_ref,    # (H, 4H) (H, 4H) (1, 4H)
                           fcw_ref, fcb_ref,              # (H, O)  (1, O)
                           mt_ref,                        # (TB, 2) = [month, temp] at t=0
                           out_ref):                      # (TB, O)
    S, B, H4 = g0_ref.shape
    H = whh0_ref.shape[0]
    O = out_ref.shape[1]

    # Hoist all weight loads / bias broadcast above the recurrence.
    whh0 = whh0_ref[...]
    wih1 = wih1_ref[...]
    whh1 = whh1_ref[...]
    b1 = jnp.broadcast_to(b1_ref[...], (B, H4))

    def gates(g):
        # Full-width nonlinearities over the 4H (= one vreg lane width when H=32)
        # gate tensor, then slice i/f/g/o: 2 EUP pushes instead of 4 sub-vreg ones.
        sig = jax.nn.sigmoid(g)
        th = jnp.tanh(g)
        i = sig[:, 0:H]
        f = sig[:, H:2 * H]
        gg = th[:, 2 * H:3 * H]
        o = sig[:, 3 * H:4 * H]
        return i, f, gg, o

    def step(t, carry):
        h0, c0, h1, c1 = carry
        # Layer 0: input projection + both biases already folded into g0_ref[t].
        ga = g0_ref[t] + jnp.dot(h0, whh0, preferred_element_type=jnp.float32)
        i0, f0, gg0, o0 = gates(ga)
        c0 = f0 * c0 + i0 * gg0
        h0 = o0 * jnp.tanh(c0)
        # Layer 1 (inter-layer dropout is identity in eval mode). Two separate dots so
        # h1@whh1 (depends only on step t-1) can overlap with the layer-0 chain above.
        gb = (jnp.dot(h0, wih1, preferred_element_type=jnp.float32)
              + jnp.dot(h1, whh1, preferred_element_type=jnp.float32)
              + b1)
        i1, f1, gg1, o1 = gates(gb)
        c1 = f1 * c1 + i1 * gg1
        h1 = o1 * jnp.tanh(c1)
        return (h0, c0, h1, c1)

    zeros = jnp.zeros((B, H), jnp.float32)
    _, _, h1, _ = lax.fori_loop(0, S, step, (zeros, zeros, zeros, zeros), unroll=True)

    # fc head on last-timestep hidden state of the top layer.
    out = jnp.dot(h1, fcw_ref[...], preferred_element_type=jnp.float32) + fcb_ref[...]  # (B, O)

    # Geo post-processing (month = x[:,0,1], temp = x[:,0,4] supplied pre-extracted).
    # Full-width compute + lane-iota select: avoids width-1 lane slices of `out` and the
    # concatenate on the store path, leaving a single full-width masked store.
    month = mt_ref[:, 0:1]
    temp = mt_ref[:, 1:2]
    lon_adj = (month - 0.5) * 20.0 + (temp - 0.5) * 10.0   # (B, 1)
    lat_adj = (month - 0.5) * 15.0 + (temp - 0.5) * 7.5    # (B, 1)
    sig = jax.nn.sigmoid(out)                              # full-width; cols 2,3 unused
    lon_full = jnp.clip(sig * 80.0 + 100.0 + lon_adj, 100.0, 180.0)
    lat_full = jnp.clip(sig * 40.0 + lat_adj, 0.0, 40.0)
    col = lax.broadcasted_iota(jnp.int32, (B, O), 1)
    out_ref[...] = jnp.where(col == 0, lon_full,
                             jnp.where(col == 1, lat_full, out))


def spawn_predictor_forward(x, params):
    """Mirrors the PyTorch module's batch_first forward (eval mode)."""
    x = jnp.asarray(x, jnp.float32)
    if x.ndim == 1:
        x = x[None, :]          # matches x.unsqueeze(0) in the module
    if x.ndim == 2:
        x = x[:, None, :]       # matches x.unsqueeze(1) in the module
    B, S, F = x.shape
    H = params["w_hh_l0"].shape[1]
    O = params["fc_w"].shape[0]
    H4 = 4 * H

    # ---- Hoist the layer-0 input projection off the serial recurrence (one matmul). ----
    x_tm = jnp.transpose(x, (1, 0, 2))                                    # (S, B, F) time-major
    b0 = params["b_ih_l0"] + params["b_hh_l0"]                            # (4H,)
    g0 = jnp.einsum("sbf,gf->sbg", x_tm, params["w_ih_l0"]) + b0          # (S, B, 4H)

    # Remaining (small) weights, pre-transposed so the kernel does plain (B,H)@(H,4H).
    whh0 = params["w_hh_l0"].T                                            # (H, 4H)
    wih1 = params["w_ih_l1"].T                                            # (H, 4H)
    whh1 = params["w_hh_l1"].T                                            # (H, 4H)
    b1 = (params["b_ih_l1"] + params["b_hh_l1"])[None, :]                 # (1, 4H)
    fcw = params["fc_w"].T                                                # (H, O)
    fcb = params["fc_b"][None, :]                                         # (1, O)
    # TODO(synk): for v6e/v7x production, cast whh0/wih1/whh1/fcw (and the h carries) to
    # bfloat16 with f32 accumulation to match the bf16 MXU datapath.

    # Only month/temp of timestep 0 are needed from x for the geo post-processing.
    mt = jnp.stack([x[:, 0, 1], x[:, 0, 4]], axis=1)                      # (B, 2)

    # ---- Batch tiling over a "parallel" grid axis (megacore on v7x, bounded VMEM). ----
    TB = 256 if B > 256 else max(8, -(-B // 8) * 8)
    B_pad = -(-B // TB) * TB
    if B_pad != B:
        g0 = jnp.pad(g0, ((0, 0), (0, B_pad - B), (0, 0)))
        mt = jnp.pad(mt, ((0, B_pad - B), (0, 0)))
    grid = (B_pad // TB,)

    out = pl.pallas_call(
        spawn_predictor_kernel,
        out_shape=jax.ShapeDtypeStruct((B_pad, O), jnp.float32),
        grid=grid,
        in_specs=[
            pl.BlockSpec((S, TB, H4), lambda b: (0, b, 0)),   # precomputed layer-0 gates
            pl.BlockSpec((H, H4), lambda b: (0, 0)),          # whh0
            pl.BlockSpec((H, H4), lambda b: (0, 0)),          # wih1
            pl.BlockSpec((H, H4), lambda b: (0, 0)),          # whh1
            pl.BlockSpec((1, H4), lambda b: (0, 0)),          # b1 (combined layer-1 bias)
            pl.BlockSpec((H, O), lambda b: (0, 0)),           # fc weight
            pl.BlockSpec((1, O), lambda b: (0, 0)),           # fc bias
            pl.BlockSpec((TB, 2), lambda b: (b, 0)),          # [month, temp]
        ],
        out_specs=pl.BlockSpec((TB, O), lambda b: (b, 0)),
        compiler_params=pltpu.CompilerParams(dimension_semantics=("parallel",)),
    )(g0, whh0, wih1, whh1, b1, fcw, fcb, mt)
    # TODO(synk): if S grows large, add a trailing "arbitrary" time-chunk grid axis and
    # carry h/c in pltpu.VMEM scratch so the gate chunks stream instead of fully resident.
    return out[:B]


def make_params(key, input_size, hidden_size, output_size=4):
    H = hidden_size
    k = 1.0 / np.sqrt(H)
    names_shapes = [
        ("w_ih_l0", (4 * H, input_size)),
        ("w_hh_l0", (4 * H, H)),
        ("b_ih_l0", (4 * H,)),
        ("b_hh_l0", (4 * H,)),
        ("w_ih_l1", (4 * H, H)),
        ("w_hh_l1", (4 * H, H)),
        ("b_ih_l1", (4 * H,)),
        ("b_hh_l1", (4 * H,)),
        ("fc_w", (output_size, H)),
        ("fc_b", (output_size,)),
    ]
    keys = jax.random.split(key, len(names_shapes))
    return {
        name: jax.random.uniform(kk, shape, jnp.float32, minval=-k, maxval=k)
        for kk, (name, shape) in zip(keys, names_shapes)
    }


def reference_forward(x, params):
    """Pure-JAX reference of the PyTorch forward (eval mode)."""
    x = jnp.asarray(x, jnp.float32)
    B, S, F = x.shape
    H = params["w_hh_l0"].shape[1]

    def cell(x_t, h, c, wih, whh, bih, bhh):
        g = x_t @ wih.T + bih + h @ whh.T + bhh
        i, f, gg, o = jnp.split(g, 4, axis=1)
        i, f, o = jax.nn.sigmoid(i), jax.nn.sigmoid(f), jax.nn.sigmoid(o)
        gg = jnp.tanh(gg)
        c = f * c + i * gg
        h = o * jnp.tanh(c)
        return h, c

    h0 = c0 = h1 = c1 = jnp.zeros((B, H), jnp.float32)
    for t in range(S):
        x_t = x[:, t, :]
        h0, c0 = cell(x_t, h0, c0, params["w_ih_l0"], params["w_hh_l0"],
                      params["b_ih_l0"], params["b_hh_l0"])
        h1, c1 = cell(h0, h1, c1, params["w_ih_l1"], params["w_hh_l1"],
                      params["b_ih_l1"], params["b_hh_l1"])
    out = h1 @ params["fc_w"].T + params["fc_b"]
    lon = jax.nn.sigmoid(out[:, 0]) * 80.0 + 100.0
    lat = jax.nn.sigmoid(out[:, 1]) * 40.0
    month = x[:, 0, 1]
    temp = x[:, 0, 4]
    lon = jnp.clip(lon + (month - 0.5) * 20.0 + (temp - 0.5) * 10.0, 100.0, 180.0)
    lat = jnp.clip(lat + (month - 0.5) * 15.0 + (temp - 0.5) * 7.5, 0.0, 40.0)
    return jnp.stack([lon, lat, out[:, 2], out[:, 3]], axis=1)


if __name__ == "__main__":
    B, S, F, H = 8, 8, 6, 32   # batch, seq, input_size (>=5 for month/temp cols), hidden
    key = jax.random.PRNGKey(0)
    k_x, k_p = jax.random.split(key)
    x = jax.random.uniform(k_x, (B, S, F), jnp.float32)   # normalized-feature-like inputs
    params = make_params(k_p, F, H)

    out = spawn_predictor_forward(x, params)
    out = jax.block_until_ready(out)

    ref = reference_forward(x, params)
    np.testing.assert_allclose(np.asarray(out), np.asarray(ref), rtol=1e-4, atol=1e-4)
    assert out.shape == (B, 4)
    print("KERNEL_OK")
</pallas_src>

<mosaic_0001>
module attributes {stable_mosaic.version = 11 : i64} {
  func.func @spawn_predictor_kernel(%arg0: i32, %arg1: memref<8x8x128xf32, #tpu.memory_space<vmem>>, %arg2: memref<32x128xf32, #tpu.memory_space<vmem>>, %arg3: memref<32x128xf32, #tpu.memory_space<vmem>>, %arg4: memref<32x128xf32, #tpu.memory_space<vmem>>, %arg5: memref<1x128xf32, #tpu.memory_space<vmem>>, %arg6: memref<32x4xf32, #tpu.memory_space<vmem>>, %arg7: memref<1x4xf32, #tpu.memory_space<vmem>>, %arg8: memref<8x2xf32, #tpu.memory_space<vmem>>, %arg9: memref<8x4xf32, #tpu.memory_space<vmem>>) attributes {dimension_semantics = [#tpu.dimension_semantics<parallel>], iteration_bounds = array<i64: 1>, scalar_prefetch = 0 : i64, scratch_operands = 0 : i64, tpu.core_type = #tpu.core_type<tc>, window_params = [{transform_indices = @transform_0, window_bounds = array<i64: 8, 8, 128>}, {pipeline_mode = #tpu.pipeline_mode<synchronous>, transform_indices = @transform_1, window_bounds = array<i64: 32, 128>}, {pipeline_mode = #tpu.pipeline_mode<synchronous>, transform_indices = @transform_2, window_bounds = array<i64: 32, 128>}, {pipeline_mode = #tpu.pipeline_mode<synchronous>, transform_indices = @transform_3, window_bounds = array<i64: 32, 128>}, {pipeline_mode = #tpu.pipeline_mode<synchronous>, transform_indices = @transform_4, window_bounds = array<i64: 1, 128>}, {pipeline_mode = #tpu.pipeline_mode<synchronous>, transform_indices = @transform_5, window_bounds = array<i64: 32, 4>}, {pipeline_mode = #tpu.pipeline_mode<synchronous>, transform_indices = @transform_6, window_bounds = array<i64: 1, 4>}, {transform_indices = @transform_7, window_bounds = array<i64: 8, 2>}, {transform_indices = @transform_8, window_bounds = array<i64: 8, 4>}]} {
    %c0 = arith.constant 0 : index
    %c0_0 = arith.constant 0 : index
    %0 = vector.load %arg2[%c0, %c0_0] : memref<32x128xf32, #tpu.memory_space<vmem>>, vector<32x128xf32>
    %c0_1 = arith.constant 0 : index
    %c0_2 = arith.constant 0 : index
    %1 = vector.load %arg3[%c0_1, %c0_2] : memref<32x128xf32, #tpu.memory_space<vmem>>, vector<32x128xf32>
    %c0_3 = arith.constant 0 : index
    %c0_4 = arith.constant 0 : index
    %2 = vector.load %arg4[%c0_3, %c0_4] : memref<32x128xf32, #tpu.memory_space<vmem>>, vector<32x128xf32>
    %c0_5 = arith.constant 0 : index
    %c0_6 = arith.constant 0 : index
    %3 = vector.load %arg5[%c0_5, %c0_6] : memref<1x128xf32, #tpu.memory_space<vmem>>, vector<1x128xf32>
    %4 = vector.shape_cast %3 : vector<1x128xf32> to vector<1x128xf32>
    %5 = vector.broadcast %4 : vector<1x128xf32> to vector<8x128xf32>
    %cst = arith.constant 0.000000e+00 : f32
    %6 = vector.broadcast %cst : f32 to vector<8x32xf32>
    %c0_i32 = arith.constant 0 : i32
    %7 = arith.index_cast %c0_i32 : i32 to index
    %c0_7 = arith.constant 0 : index
    %c0_8 = arith.constant 0 : index
    %8 = vector.load %arg1[%7, %c0_7, %c0_8] : memref<8x8x128xf32, #tpu.memory_space<vmem>>, vector<1x8x128xf32>
    %9 = vector.shape_cast %8 : vector<1x8x128xf32> to vector<8x128xf32>
    %cst_9 = arith.constant dense<0.000000e+00> : vector<8x128xf32>
    %10 = tpu.matmul %6, %0, %cst_9 {dimension_numbers = #tpu.dot_dimension_numbers<[1], [0], [0], [1], [0, 0, 1, 1], [], []>} : vector<8x32xf32>, vector<32x128xf32>, vector<8x128xf32> -> vector<8x128xf32>
    %11 = arith.addf %9, %10 : vector<8x128xf32>
    %12 = arith.negf %11 : vector<8x128xf32>
    %13 = math.exp %12 : vector<8x128xf32>
    %cst_10 = arith.constant 1.000000e+00 : f32
    %14 = vector.broadcast %cst_10 : f32 to vector<8x128xf32>
    %15 = arith.addf %14, %13 : vector<8x128xf32>
    %16 = arith.divf %14, %15 : vector<8x128xf32>
    %17 = math.tanh %11 : vector<8x128xf32>
    %18 = vector.extract_strided_slice %16 {offsets = [0, 0], sizes = [8, 32], strides = [1, 1]} : vector<8x128xf32> to vector<8x32xf32>
    %19 = vector.extract_strided_slice %16 {offsets = [0, 32], sizes = [8, 32], strides = [1, 1]} : vector<8x128xf32> to vector<8x32xf32>
    %20 = vector.extract_strided_slice %17 {offsets = [0, 64], sizes = [8, 32], strides = [1, 1]} : vector<8x128xf32> to vector<8x32xf32>
    %21 = vector.extract_strided_slice %16 {offsets = [0, 96], sizes = [8, 32], strides = [1, 1]} : vector<8x128xf32> to vector<8x32xf32>
    %22 = arith.mulf %19, %6 : vector<8x32xf32>
    %23 = arith.mulf %18, %20 : vector<8x32xf32>
    %24 = arith.addf %22, %23 : vector<8x32xf32>
    %25 = math.tanh %24 : vector<8x32xf32>
    %26 = arith.mulf %21, %25 : vector<8x32xf32>
    %cst_11 = arith.constant dense<0.000000e+00> : vector<8x128xf32>
    %27 = tpu.matmul %26, %1, %cst_11 {dimension_numbers = #tpu.dot_dimension_numbers<[1], [0], [0], [1], [0, 0, 1, 1], [], []>} : vector<8x32xf32>, vector<32x128xf32>, vector<8x128xf32> -> vector<8x128xf32>
    %cst_12 = arith.constant dense<0.000000e+00> : vector<8x128xf32>
    %28 = tpu.matmul %6, %2, %cst_12 {dimension_numbers = #tpu.dot_dimension_numbers<[1], [0], [0], [1], [0, 0, 1, 1], [], []>} : vector<8x32xf32>, vector<32x128xf32>, vector<8x128xf32> -> vector<8x128xf32>
    %29 = arith.addf %27, %28 : vector<8x128xf32>
    %30 = arith.addf %29, %5 : vector<8x128xf32>
    %31 = arith.negf %30 : vector<8x128xf32>
    %32 = math.exp %31 : vector<8x128xf32>
    %cst_13 = arith.constant 1.000000e+00 : f32
    %33 = vector.broadcast %cst_13 : f32 to vector<8x128xf32>
    %34 = arith.addf %33, %32 : vector<8x128xf32>
    %35 = arith.divf %33, %34 : vector<8x128xf32>
    %36 = math.tanh %30 : vector<8x128xf32>
    %37 = vector.extract_strided_slice %35 {offsets = [0, 0], sizes = [8, 32], strides = [1, 1]} : vector<8x128xf32> to vector<8x32xf32>
    %38 = vector.extract_strided_slice %35 {offsets = [0, 32], sizes = [8, 32], strides = [1, 1]} : vector<8x128xf32> to vector<8x32xf32>
    %39 = vector.extract_strided_slice %36 {offsets = [0, 64], sizes = [8, 32], strides = [1, 1]} : vector<8x128xf32> to vector<8x32xf32>
    %40 = vector.extract_strided_slice %35 {offsets = [0, 96], sizes = [8, 32], strides = [1, 1]} : vector<8x128xf32> to vector<8x32xf32>
    %41 = arith.mulf %38, %6 : vector<8x32xf32>
    %42 = arith.mulf %37, %39 : vector<8x32xf32>
    %43 = arith.addf %41, %42 : vector<8x32xf32>
    %44 = math.tanh %43 : vector<8x32xf32>
    %45 = arith.mulf %40, %44 : vector<8x32xf32>
    %c1_i32 = arith.constant 1 : i32
    %46 = arith.index_cast %c1_i32 : i32 to index
    %c0_14 = arith.constant 0 : index
    %c0_15 = arith.constant 0 : index
    %47 = vector.load %arg1[%46, %c0_14, %c0_15] : memref<8x8x128xf32, #tpu.memory_space<vmem>>, vector<1x8x128xf32>
    %48 = vector.shape_cast %47 : vector<1x8x128xf32> to vector<8x128xf32>
    %cst_16 = arith.constant dense<0.000000e+00> : vector<8x128xf32>
    %49 = tpu.matmul %26, %0, %cst_16 {dimension_numbers = #tpu.dot_dimension_numbers<[1], [0], [0], [1], [0, 0, 1, 1], [], []>} : vector<8x32xf32>, vector<32x128xf32>, vector<8x128xf32> -> vector<8x128xf32>
    %50 = arith.addf %48, %49 : vector<8x128xf32>
    %51 = arith.negf %50 : vector<8x128xf32>
    %52 = math.exp %51 : vector<8x128xf32>
    %cst_17 = arith.constant 1.000000e+00 : f32
    %53 = vector.broadcast %cst_17 : f32 to vector<8x128xf32>
    %54 = arith.addf %53, %52 : vector<8x128xf32>
    %55 = arith.divf %53, %54 : vector<8x128xf32>
    %56 = math.tanh %50 : vector<8x128xf32>
    %57 = vector.extract_strided_slice %55 {offsets = [0, 0], sizes = [8, 32], strides = [1, 1]} : vector<8x128xf32> to vector<8x32xf32>
    %58 = vector.extract_strided_slice %55 {offsets = [0, 32], sizes = [8, 32], strides = [1, 1]} : vector<8x128xf32> to vector<8x32xf32>
    %59 = vector.extract_strided_slice %56 {offsets = [0, 64], sizes = [8, 32], strides = [1, 1]} : vector<8x128xf32> to vector<8x32xf32>
    %60 = vector.extract_strided_slice %55 {offsets = [0, 96], sizes = [8, 32], strides = [1, 1]} : vector<8x128xf32> to vector<8x32xf32>
    %61 = arith.mulf %58, %24 : vector<8x32xf32>
    %62 = arith.mulf %57, %59 : vector<8x32xf32>
    %63 = arith.addf %61, %62 : vector<8x32xf32>
    %64 = math.tanh %63 : vector<8x32xf32>
    %65 = arith.mulf %60, %64 : vector<8x32xf32>
    %cst_18 = arith.constant dense<0.000000e+00> : vector<8x128xf32>
    %66 = tpu.matmul %65, %1, %cst_18 {dimension_numbers = #tpu.dot_dimension_numbers<[1], [0], [0], [1], [0, 0, 1, 1], [], []>} : vector<8x32xf32>, vector<32x128xf32>, vector<8x128xf32> -> vector<8x128xf32>
    %cst_19 = arith.constant dense<0.000000e+00> : vector<8x128xf32>
    %67 = tpu.matmul %45, %2, %cst_19 {dimension_numbers = #tpu.dot_dimension_numbers<[1], [0], [0], [1], [0, 0, 1, 1], [], []>} : vector<8x32xf32>, vector<32x128xf32>, vector<8x128xf32> -> vector<8x128xf32>
    %68 = arith.addf %66, %67 : vector<8x128xf32>
    %69 = arith.addf %68, %5 : vector<8x128xf32>
    %70 = arith.negf %69 : vector<8x128xf32>
    %71 = math.exp %70 : vector<8x128xf32>
    %cst_20 = arith.constant 1.000000e+00 : f32
    %72 = vector.broadcast %cst_20 : f32 to vector<8x128xf32>
    %73 = arith.addf %72, %71 : vector<8x128xf32>
    %74 = arith.divf %72, %73 : vector<8x128xf32>
    %75 = math.tanh %69 : vector<8x128xf32>
    %76 = vector.extract_strided_slice %74 {offsets = [0, 0], sizes = [8, 32], strides = [1, 1]} : vector<8x128xf32> to vector<8x32xf32>
    %77 = vector.extract_strided_slice %74 {offsets = [0, 32], sizes = [8, 32], strides = [1, 1]} : vector<8x128xf32> to vector<8x32xf32>
    %78 = vector.extract_strided_slice %75 {offsets = [0, 64], sizes = [8, 32], strides = [1, 1]} : vector<8x128xf32> to vector<8x32xf32>
    %79 = vector.extract_strided_slice %74 {offsets = [0, 96], sizes = [8, 32], strides = [1, 1]} : vector<8x128xf32> to vector<8x32xf32>
    %80 = arith.mulf %77, %43 : vector<8x32xf32>
    %81 = arith.mulf %76, %78 : vector<8x32xf32>
    %82 = arith.addf %80, %81 : vector<8x32xf32>
    %83 = math.tanh %82 : vector<8x32xf32>
    %84 = arith.mulf %79, %83 : vector<8x32xf32>
    %c2_i32 = arith.constant 2 : i32
    %85 = arith.index_cast %c2_i32 : i32 to index
    %c0_21 = arith.constant 0 : index
    %c0_22 = arith.constant 0 : index
    %86 = vector.load %arg1[%85, %c0_21, %c0_22] : memref<8x8x128xf32, #tpu.memory_space<vmem>>, vector<1x8x128xf32>
    %87 = vector.shape_cast %86 : vector<1x8x128xf32> to vector<8x128xf32>
    %cst_23 = arith.constant dense<0.000000e+00> : vector<8x128xf32>
    %88 = tpu.matmul %65, %0, %cst_23 {dimension_numbers = #tpu.dot_dimension_numbers<[1], [0], [0], [1], [0, 0, 1, 1], [], []>} : vector<8x32xf32>, vector<32x128xf32>, vector<8x128xf32> -> vector<8x128xf32>
    %89 = arith.addf %87, %88 : vector<8x128xf32>
    %90 = arith.negf %89 : vector<8x128xf32>
    %91 = math.exp %90 : vector<8x128xf32>
    %cst_24 = arith.constant 1.000000e+00 : f32
    %92 = vector.broadcast %cst_24 : f32 to vector<8x128xf32>
    %93 = arith.addf %92, %91 : vector<8x128xf32>
    %94 = arith.divf %92, %93 : vector<8x128xf32>
    %95 = math.tanh %89 : vector<8x128xf32>
    %96 = vector.extract_strided_slice %94 {offsets = [0, 0], sizes = [8, 32], strides = [1, 1]} : vector<8x128xf32> to vector<8x32xf32>
    %97 = vector.extract_strided_slice %94 {offsets = [0, 32], sizes = [8, 32], strides = [1, 1]} : vector<8x128xf32> to vector<8x32xf32>
    %98 = vector.extract_strided_slice %95 {offsets = [0, 64], sizes = [8, 32], strides = [1, 1]} : vector<8x128xf32> to vector<8x32xf32>
    %99 = vector.extract_strided_slice %94 {offsets = [0, 96], sizes = [8, 32], strides = [1, 1]} : vector<8x128xf32> to vector<8x32xf32>
    %100 = arith.mulf %97, %63 : vector<8x32xf32>
    %101 = arith.mulf %96, %98 : vector<8x32xf32>
    %102 = arith.addf %100, %101 : vector<8x32xf32>
    %103 = math.tanh %102 : vector<8x32xf32>
    %104 = arith.mulf %99, %103 : vector<8x32xf32>
    %cst_25 = arith.constant dense<0.000000e+00> : vector<8x128xf32>
    %105 = tpu.matmul %104, %1, %cst_25 {dimension_numbers = #tpu.dot_dimension_numbers<[1], [0], [0], [1], [0, 0, 1, 1], [], []>} : vector<8x32xf32>, vector<32x128xf32>, vector<8x128xf32> -> vector<8x128xf32>
    %cst_26 = arith.constant dense<0.000000e+00> : vector<8x128xf32>
    %106 = tpu.matmul %84, %2, %cst_26 {dimension_numbers = #tpu.dot_dimension_numbers<[1], [0], [0], [1], [0, 0, 1, 1], [], []>} : vector<8x32xf32>, vector<32x128xf32>, vector<8x128xf32> -> vector<8x128xf32>
    %107 = arith.addf %105, %106 : vector<8x128xf32>
    %108 = arith.addf %107, %5 : vector<8x128xf32>
    %109 = arith.negf %108 : vector<8x128xf32>
    %110 = math.exp %109 : vector<8x128xf32>
    %cst_27 = arith.constant 1.000000e+00 : f32
    %111 = vector.broadcast %cst_27 : f32 to vector<8x128xf32>
    %112 = arith.addf %111, %110 : vector<8x128xf32>
    %113 = arith.divf %111, %112 : vector<8x128xf32>
    %114 = math.tanh %108 : vector<8x128xf32>
    %115 = vector.extract_strided_slice %113 {offsets = [0, 0], sizes = [8, 32], strides = [1, 1]} : vector<8x128xf32> to vector<8x32xf32>
    %116 = vector.extract_strided_slice %113 {offsets = [0, 32], sizes = [8, 32], strides = [1, 1]} : vector<8x128xf32> to vector<8x32xf32>
    %117 = vector.extract_strided_slice %114 {offsets = [0, 64], sizes = [8, 32], strides = [1, 1]} : vector<8x128xf32> to vector<8x32xf32>
    %118 = vector.extract_strided_slice %113 {offsets = [0, 96], sizes = [8, 32], strides = [1, 1]} : vector<8x128xf32> to vector<8x32xf32>
    %119 = arith.mulf %116, %82 : vector<8x32xf32>
    %120 = arith.mulf %115, %117 : vector<8x32xf32>
    %121 = arith.addf %119, %120 : vector<8x32xf32>
    %122 = math.tanh %121 : vector<8x32xf32>
    %123 = arith.mulf %118, %122 : vector<8x32xf32>
    %c3_i32 = arith.constant 3 : i32
    %124 = arith.index_cast %c3_i32 : i32 to index
    %c0_28 = arith.constant 0 : index
    %c0_29 = arith.constant 0 : index
    %125 = vector.load %arg1[%124, %c0_28, %c0_29] : memref<8x8x128xf32, #tpu.memory_space<vmem>>, vector<1x8x128xf32>
    %126 = vector.shape_cast %125 : vector<1x8x128xf32> to vector<8x128xf32>
    %cst_30 = arith.constant dense<0.000000e+00> : vector<8x128xf32>
    %127 = tpu.matmul %104, %0, %cst_30 {dimension_numbers = #tpu.dot_dimension_numbers<[1], [0], [0], [1], [0, 0, 1, 1], [], []>} : vector<8x32xf32>, vector<32x128xf32>, vector<8x128xf32> -> vector<8x128xf32>
    %128 = arith.addf %126, %127 : vector<8x128xf32>
    %129 = arith.negf %128 : vector<8x128xf32>
    %130 = math.exp %129 : vector<8x128xf32>
    %cst_31 = arith.constant 1.000000e+00 : f32
    %131 = vector.broadcast %cst_31 : f32 to vector<8x128xf32>
    %132 = arith.addf %131, %130 : vector<8x128xf32>
    %133 = arith.divf %131, %132 : vector<8x128xf32>
    %134 = math.tanh %128 : vector<8x128xf32>
    %135 = vector.extract_strided_slice %133 {offsets = [0, 0], sizes = [8, 32], strides = [1, 1]} : vector<8x128xf32> to vector<8x32xf32>
    %136 = vector.extract_strided_slice %133 {offsets = [0, 32], sizes = [8, 32], strides = [1, 1]} : vector<8x128xf32> to vector<8x32xf32>
    %137 = vector.extract_strided_slice %134 {offsets = [0, 64], sizes = [8, 32], strides = [1, 1]} : vector<8x128xf32> to vector<8x32xf32>
    %138 = vector.extract_strided_slice %133 {offsets = [0, 96], sizes = [8, 32], strides = [1, 1]} : vector<8x128xf32> to vector<8x32xf32>
    %139 = arith.mulf %136, %102 : vector<8x32xf32>
    %140 = arith.mulf %135, %137 : vector<8x32xf32>
    %141 = arith.addf %139, %140 : vector<8x32xf32>
    %142 = math.tanh %141 : vector<8x32xf32>
    %143 = arith.mulf %138, %142 : vector<8x32xf32>
    %cst_32 = arith.constant dense<0.000000e+00> : vector<8x128xf32>
    %144 = tpu.matmul %143, %1, %cst_32 {dimension_numbers = #tpu.dot_dimension_numbers<[1], [0], [0], [1], [0, 0, 1, 1], [], []>} : vector<8x32xf32>, vector<32x128xf32>, vector<8x128xf32> -> vector<8x128xf32>
    %cst_33 = arith.constant dense<0.000000e+00> : vector<8x128xf32>
    %145 = tpu.matmul %123, %2, %cst_33 {dimension_numbers = #tpu.dot_dimension_numbers<[1], [0], [0], [1], [0, 0, 1, 1], [], []>} : vector<8x32xf32>, vector<32x128xf32>, vector<8x128xf32> -> vector<8x128xf32>
    %146 = arith.addf %144, %145 : vector<8x128xf32>
    %147 = arith.addf %146, %5 : vector<8x128xf32>
    %148 = arith.negf %147 : vector<8x128xf32>
    %149 = math.exp %148 : vector<8x128xf32>
    %cst_34 = arith.constant 1.000000e+00 : f32
    %150 = vector.broadcast %cst_34 : f32 to vector<8x128xf32>
    %151 = arith.addf %150, %149 : vector<8x128xf32>
    %152 = arith.divf %150, %151 : vector<8x128xf32>
    %153 = math.tanh %147 : vector<8x128xf32>
    %154 = vector.extract_strided_slice %152 {offsets = [0, 0], sizes = [8, 32], strides = [1, 1]} : vector<8x128xf32> to vector<8x32xf32>
    %155 = vector.extract_strided_slice %152 {offsets = [0, 32], sizes = [8, 32], strides = [1, 1]} : vector<8x128xf32> to vector<8x32xf32>
    %156 = vector.extract_strided_slice %153 {offsets = [0, 64], sizes = [8, 32], strides = [1, 1]} : vector<8x128xf32> to vector<8x32xf32>
    %157 = vector.extract_strided_slice %152 {offsets = [0, 96], sizes = [8, 32], strides = [1, 1]} : vector<8x128xf32> to vector<8x32xf32>
    %158 = arith.mulf %155, %121 : vector<8x32xf32>
    %159 = arith.mulf %154, %156 : vector<8x32xf32>
    %160 = arith.addf %158, %159 : vector<8x32xf32>
    %161 = math.tanh %160 : vector<8x32xf32>
    %162 = arith.mulf %157, %161 : vector<8x32xf32>
    %c4_i32 = arith.constant 4 : i32
    %163 = arith.index_cast %c4_i32 : i32 to index
    %c0_35 = arith.constant 0 : index
    %c0_36 = arith.constant 0 : index
    %164 = vector.load %arg1[%163, %c0_35, %c0_36] : memref<8x8x128xf32, #tpu.memory_space<vmem>>, vector<1x8x128xf32>
    %165 = vector.shape_cast %164 : vector<1x8x128xf32> to vector<8x128xf32>
    %cst_37 = arith.constant dense<0.000000e+00> : vector<8x128xf32>
    %166 = tpu.matmul %143, %0, %cst_37 {dimension_numbers = #tpu.dot_dimension_numbers<[1], [0], [0], [1], [0, 0, 1, 1], [], []>} : vector<8x32xf32>, vector<32x128xf32>, vector<8x128xf32> -> vector<8x128xf32>
    %167 = arith.addf %165, %166 : vector<8x128xf32>
    %168 = arith.negf %167 : vector<8x128xf32>
    %169 = math.exp %168 : vector<8x128xf32>
    %cst_38 = arith.constant 1.000000e+00 : f32
    %170 = vector.broadcast %cst_38 : f32 to vector<8x128xf32>
    %171 = arith.addf %170, %169 : vector<8x128xf32>
    %172 = arith.divf %170, %171 : vector<8x128xf32>
    %173 = math.tanh %167 : vector<8x128xf32>
    %174 = vector.extract_strided_slice %172 {offsets = [0, 0], sizes = [8, 32], strides = [1, 1]} : vector<8x128xf32> to vector<8x32xf32>
    %175 = vector.extract_strided_slice %172 {offsets = [0, 32], sizes = [8, 32], strides = [1, 1]} : vector<8x128xf32> to vector<8x32xf32>
    %176 = vector.extract_strided_slice %173 {offsets = [0, 64], sizes = [8, 32], strides = [1, 1]} : vector<8x128xf32> to vector<8x32xf32>
    %177 = vector.extract_strided_slice %172 {offsets = [0, 96], sizes = [8, 32], strides = [1, 1]} : vector<8x128xf32> to vector<8x32xf32>
    %178 = arith.mulf %175, %141 : vector<8x32xf32>
    %179 = arith.mulf %174, %176 : vector<8x32xf32>
    %180 = arith.addf %178, %179 : vector<8x32xf32>
    %181 = math.tanh %180 : vector<8x32xf32>
    %182 = arith.mulf %177, %181 : vector<8x32xf32>
    %cst_39 = arith.constant dense<0.000000e+00> : vector<8x128xf32>
    %183 = tpu.matmul %182, %1, %cst_39 {dimension_numbers = #tpu.dot_dimension_numbers<[1], [0], [0], [1], [0, 0, 1, 1], [], []>} : vector<8x32xf32>, vector<32x128xf32>, vector<8x128xf32> -> vector<8x128xf32>
    %cst_40 = arith.constant dense<0.000000e+00> : vector<8x128xf32>
    %184 = tpu.matmul %162, %2, %cst_40 {dimension_numbers = #tpu.dot_dimension_numbers<[1], [0], [0], [1], [0, 0, 1, 1], [], []>} : vector<8x32xf32>, vector<32x128xf32>, vector<8x128xf32> -> vector<8x128xf32>
    %185 = arith.addf %183, %184 : vector<8x128xf32>
    %186 = arith.addf %185, %5 : vector<8x128xf32>
    %187 = arith.negf %186 : vector<8x128xf32>
    %188 = math.exp %187 : vector<8x128xf32>
    %cst_41 = arith.constant 1.000000e+00 : f32
    %189 = vector.broadcast %cst_41 : f32 to vector<8x128xf32>
    %190 = arith.addf %189, %188 : vector<8x128xf32>
    %191 = arith.divf %189, %190 : vector<8x128xf32>
    %192 = math.tanh %186 : vector<8x128xf32>
    %193 = vector.extract_strided_slice %191 {offsets = [0, 0], sizes = [8, 32], strides = [1, 1]} : vector<8x128xf32> to vector<8x32xf32>
    %194 = vector.extract_strided_slice %191 {offsets = [0, 32], sizes = [8, 32], strides = [1, 1]} : vector<8x128xf32> to vector<8x32xf32>
    %195 = vector.extract_strided_slice %192 {offsets = [0, 64], sizes = [8, 32], strides = [1, 1]} : vector<8x128xf32> to vector<8x32xf32>
    %196 = vector.extract_strided_slice %191 {offsets = [0, 96], sizes = [8, 32], strides = [1, 1]} : vector<8x128xf32> to vector<8x32xf32>
    %197 = arith.mulf %194, %160 : vector<8x32xf32>
    %198 = arith.mulf %193, %195 : vector<8x32xf32>
    %199 = arith.addf %197, %198 : vector<8x32xf32>
    %200 = math.tanh %199 : vector<8x32xf32>
    %201 = arith.mulf %196, %200 : vector<8x32xf32>
    %c5_i32 = arith.constant 5 : i32
    %202 = arith.index_cast %c5_i32 : i32 to index
    %c0_42 = arith.constant 0 : index
    %c0_43 = arith.constant 0 : index
    %203 = vector.load %arg1[%202, %c0_42, %c0_43] : memref<8x8x128xf32, #tpu.memory_space<vmem>>, vector<1x8x128xf32>
    %204 = vector.shape_cast %203 : vector<1x8x128xf32> to vector<8x128xf32>
    %cst_44 = arith.constant dense<0.000000e+00> : vector<8x128xf32>
    %205 = tpu.matmul %182, %0, %cst_44 {dimension_numbers = #tpu.dot_dimension_numbers<[1], [0], [0], [1], [0, 0, 1, 1], [], []>} : vector<8x32xf32>, vector<32x128xf32>, vector<8x128xf32> -> vector<8x128xf32>
    %206 = arith.addf %204, %205 : vector<8x128xf32>
    %207 = arith.negf %206 : vector<8x128xf32>
    %208 = math.exp %207 : vector<8x128xf32>
    %cst_45 = arith.constant 1.000000e+00 : f32
    %209 = vector.broadcast %cst_45 : f32 to vector<8x128xf32>
    %210 = arith.addf %209, %208 : vector<8x128xf32>
    %211 = arith.divf %209, %210 : vector<8x128xf32>
    %212 = math.tanh %206 : vector<8x128xf32>
    %213 = vector.extract_strided_slice %211 {offsets = [0, 0], sizes = [8, 32], strides = [1, 1]} : vector<8x128xf32> to vector<8x32xf32>
    %214 = vector.extract_strided_slice %211 {offsets = [0, 32], sizes = [8, 32], strides = [1, 1]} : vector<8x128xf32> to vector<8x32xf32>
    %215 = vector.extract_strided_slice %212 {offsets = [0, 64], sizes = [8, 32], strides = [1, 1]} : vector<8x128xf32> to vector<8x32xf32>
    %216 = vector.extract_strided_slice %211 {offsets = [0, 96], sizes = [8, 32], strides = [1, 1]} : vector<8x128xf32> to vector<8x32xf32>
    %217 = arith.mulf %214, %180 : vector<8x32xf32>
    %218 = arith.mulf %213, %215 : vector<8x32xf32>
    %219 = arith.addf %217, %218 : vector<8x32xf32>
    %220 = math.tanh %219 : vector<8x32xf32>
    %221 = arith.mulf %216, %220 : vector<8x32xf32>
    %cst_46 = arith.constant dense<0.000000e+00> : vector<8x128xf32>
    %222 = tpu.matmul %221, %1, %cst_46 {dimension_numbers = #tpu.dot_dimension_numbers<[1], [0], [0], [1], [0, 0, 1, 1], [], []>} : vector<8x32xf32>, vector<32x128xf32>, vector<8x128xf32> -> vector<8x128xf32>
    %cst_47 = arith.constant dense<0.000000e+00> : vector<8x128xf32>
    %223 = tpu.matmul %201, %2, %cst_47 {dimension_numbers = #tpu.dot_dimension_numbers<[1], [0], [0], [1], [0, 0, 1, 1], [], []>} : vector<8x32xf32>, vector<32x128xf32>, vector<8x128xf32> -> vector<8x128xf32>
    %224 = arith.addf %222, %223 : vector<8x128xf32>
    %225 = arith.addf %224, %5 : vector<8x128xf32>
    %226 = arith.negf %225 : vector<8x128xf32>
    %227 = math.exp %226 : vector<8x128xf32>
    %cst_48 = arith.constant 1.000000e+00 : f32
    %228 = vector.broadcast %cst_48 : f32 to vector<8x128xf32>
    %229 = arith.addf %228, %227 : vector<8x128xf32>
    %230 = arith.divf %228, %229 : vector<8x128xf32>
    %231 = math.tanh %225 : vector<8x128xf32>
    %232 = vector.extract_strided_slice %230 {offsets = [0, 0], sizes = [8, 32], strides = [1, 1]} : vector<8x128xf32> to vector<8x32xf32>
    %233 = vector.extract_strided_slice %230 {offsets = [0, 32], sizes = [8, 32], strides = [1, 1]} : vector<8x128xf32> to vector<8x32xf32>
    %234 = vector.extract_strided_slice %231 {offsets = [0, 64], sizes = [8, 32], strides = [1, 1]} : vector<8x128xf32> to vector<8x32xf32>
    %235 = vector.extract_strided_slice %230 {offsets = [0, 96], sizes = [8, 32], strides = [1, 1]} : vector<8x128xf32> to vector<8x32xf32>
    %236 = arith.mulf %233, %199 : vector<8x32xf32>
    %237 = arith.mulf %232, %234 : vector<8x32xf32>
    %238 = arith.addf %236, %237 : vector<8x32xf32>
    %239 = math.tanh %238 : vector<8x32xf32>
    %240 = arith.mulf %235, %239 : vector<8x32xf32>
    %c6_i32 = arith.constant 6 : i32
    %241 = arith.index_cast %c6_i32 : i32 to index
    %c0_49 = arith.constant 0 : index
    %c0_50 = arith.constant 0 : index
    %242 = vector.load %arg1[%241, %c0_49, %c0_50] : memref<8x8x128xf32, #tpu.memory_space<vmem>>, vector<1x8x128xf32>
    %243 = vector.shape_cast %242 : vector<1x8x128xf32> to vector<8x128xf32>
    %cst_51 = arith.constant dense<0.000000e+00> : vector<8x128xf32>
    %244 = tpu.matmul %221, %0, %cst_51 {dimension_numbers = #tpu.dot_dimension_numbers<[1], [0], [0], [1], [0, 0, 1, 1], [], []>} : vector<8x32xf32>, vector<32x128xf32>, vector<8x128xf32> -> vector<8x128xf32>
    %245 = arith.addf %243, %244 : vector<8x128xf32>
    %246 = arith.negf %245 : vector<8x128xf32>
    %247 = math.exp %246 : vector<8x128xf32>
    %cst_52 = arith.constant 1.000000e+00 : f32
    %248 = vector.broadcast %cst_52 : f32 to vector<8x128xf32>
    %249 = arith.addf %248, %247 : vector<8x128xf32>
    %250 = arith.divf %248, %249 : vector<8x128xf32>
    %251 = math.tanh %245 : vector<8x128xf32>
    %252 = vector.extract_strided_slice %250 {offsets = [0, 0], sizes = [8, 32], strides = [1, 1]} : vector<8x128xf32> to vector<8x32xf32>
    %253 = vector.extract_strided_slice %250 {offsets = [0, 32], sizes = [8, 32], strides = [1, 1]} : vector<8x128xf32> to vector<8x32xf32>
    %254 = vector.extract_strided_slice %251 {offsets = [0, 64], sizes = [8, 32], strides = [1, 1]} : vector<8x128xf32> to vector<8x32xf32>
    %255 = vector.extract_strided_slice %250 {offsets = [0, 96], sizes = [8, 32], strides = [1, 1]} : vector<8x128xf32> to vector<8x32xf32>
    %256 = arith.mulf %253, %219 : vector<8x32xf32>
    %257 = arith.mulf %252, %254 : vector<8x32xf32>
    %258 = arith.addf %256, %257 : vector<8x32xf32>
    %259 = math.tanh %258 : vector<8x32xf32>
    %260 = arith.mulf %255, %259 : vector<8x32xf32>
    %cst_53 = arith.constant dense<0.000000e+00> : vector<8x128xf32>
    %261 = tpu.matmul %260, %1, %cst_53 {dimension_numbers = #tpu.dot_dimension_numbers<[1], [0], [0], [1], [0, 0, 1, 1], [], []>} : vector<8x32xf32>, vector<32x128xf32>, vector<8x128xf32> -> vector<8x128xf32>
    %cst_54 = arith.constant dense<0.000000e+00> : vector<8x128xf32>
    %262 = tpu.matmul %240, %2, %cst_54 {dimension_numbers = #tpu.dot_dimension_numbers<[1], [0], [0], [1], [0, 0, 1, 1], [], []>} : vector<8x32xf32>, vector<32x128xf32>, vector<8x128xf32> -> vector<8x128xf32>
    %263 = arith.addf %261, %262 : vector<8x128xf32>
    %264 = arith.addf %263, %5 : vector<8x128xf32>
    %265 = arith.negf %264 : vector<8x128xf32>
    %266 = math.exp %265 : vector<8x128xf32>
    %cst_55 = arith.constant 1.000000e+00 : f32
    %267 = vector.broadcast %cst_55 : f32 to vector<8x128xf32>
    %268 = arith.addf %267, %266 : vector<8x128xf32>
    %269 = arith.divf %267, %268 : vector<8x128xf32>
    %270 = math.tanh %264 : vector<8x128xf32>
    %271 = vector.extract_strided_slice %269 {offsets = [0, 0], sizes = [8, 32], strides = [1, 1]} : vector<8x128xf32> to vector<8x32xf32>
    %272 = vector.extract_strided_slice %269 {offsets = [0, 32], sizes = [8, 32], strides = [1, 1]} : vector<8x128xf32> to vector<8x32xf32>
    %273 = vector.extract_strided_slice %270 {offsets = [0, 64], sizes = [8, 32], strides = [1, 1]} : vector<8x128xf32> to vector<8x32xf32>
    %274 = vector.extract_strided_slice %269 {offsets = [0, 96], sizes = [8, 32], strides = [1, 1]} : vector<8x128xf32> to vector<8x32xf32>
    %275 = arith.mulf %272, %238 : vector<8x32xf32>
    %276 = arith.mulf %271, %273 : vector<8x32xf32>
    %277 = arith.addf %275, %276 : vector<8x32xf32>
    %278 = math.tanh %277 : vector<8x32xf32>
    %279 = arith.mulf %274, %278 : vector<8x32xf32>
    %c7_i32 = arith.constant 7 : i32
    %280 = arith.index_cast %c7_i32 : i32 to index
    %c0_56 = arith.constant 0 : index
    %c0_57 = arith.constant 0 : index
    %281 = vector.load %arg1[%280, %c0_56, %c0_57] : memref<8x8x128xf32, #tpu.memory_space<vmem>>, vector<1x8x128xf32>
    %282 = vector.shape_cast %281 : vector<1x8x128xf32> to vector<8x128xf32>
    %cst_58 = arith.constant dense<0.000000e+00> : vector<8x128xf32>
    %283 = tpu.matmul %260, %0, %cst_58 {dimension_numbers = #tpu.dot_dimension_numbers<[1], [0], [0], [1], [0, 0, 1, 1], [], []>} : vector<8x32xf32>, vector<32x128xf32>, vector<8x128xf32> -> vector<8x128xf32>
    %284 = arith.addf %282, %283 : vector<8x128xf32>
    %285 = arith.negf %284 : vector<8x128xf32>
    %286 = math.exp %285 : vector<8x128xf32>
    %cst_59 = arith.constant 1.000000e+00 : f32
    %287 = vector.broadcast %cst_59 : f32 to vector<8x128xf32>
    %288 = arith.addf %287, %286 : vector<8x128xf32>
    %289 = arith.divf %287, %288 : vector<8x128xf32>
    %290 = math.tanh %284 : vector<8x128xf32>
    %291 = vector.extract_strided_slice %289 {offsets = [0, 0], sizes = [8, 32], strides = [1, 1]} : vector<8x128xf32> to vector<8x32xf32>
    %292 = vector.extract_strided_slice %289 {offsets = [0, 32], sizes = [8, 32], strides = [1, 1]} : vector<8x128xf32> to vector<8x32xf32>
    %293 = vector.extract_strided_slice %290 {offsets = [0, 64], sizes = [8, 32], strides = [1, 1]} : vector<8x128xf32> to vector<8x32xf32>
    %294 = vector.extract_strided_slice %289 {offsets = [0, 96], sizes = [8, 32], strides = [1, 1]} : vector<8x128xf32> to vector<8x32xf32>
    %295 = arith.mulf %292, %258 : vector<8x32xf32>
    %296 = arith.mulf %291, %293 : vector<8x32xf32>
    %297 = arith.addf %295, %296 : vector<8x32xf32>
    %298 = math.tanh %297 : vector<8x32xf32>
    %299 = arith.mulf %294, %298 : vector<8x32xf32>
    %cst_60 = arith.constant dense<0.000000e+00> : vector<8x128xf32>
    %300 = tpu.matmul %299, %1, %cst_60 {dimension_numbers = #tpu.dot_dimension_numbers<[1], [0], [0], [1], [0, 0, 1, 1], [], []>} : vector<8x32xf32>, vector<32x128xf32>, vector<8x128xf32> -> vector<8x128xf32>
    %cst_61 = arith.constant dense<0.000000e+00> : vector<8x128xf32>
    %301 = tpu.matmul %279, %2, %cst_61 {dimension_numbers = #tpu.dot_dimension_numbers<[1], [0], [0], [1], [0, 0, 1, 1], [], []>} : vector<8x32xf32>, vector<32x128xf32>, vector<8x128xf32> -> vector<8x128xf32>
    %302 = arith.addf %300, %301 : vector<8x128xf32>
    %303 = arith.addf %302, %5 : vector<8x128xf32>
    %304 = arith.negf %303 : vector<8x128xf32>
    %305 = math.exp %304 : vector<8x128xf32>
    %cst_62 = arith.constant 1.000000e+00 : f32
    %306 = vector.broadcast %cst_62 : f32 to vector<8x128xf32>
    %307 = arith.addf %306, %305 : vector<8x128xf32>
    %308 = arith.divf %306, %307 : vector<8x128xf32>
    %309 = math.tanh %303 : vector<8x128xf32>
    %310 = vector.extract_strided_slice %308 {offsets = [0, 0], sizes = [8, 32], strides = [1, 1]} : vector<8x128xf32> to vector<8x32xf32>
    %311 = vector.extract_strided_slice %308 {offsets = [0, 32], sizes = [8, 32], strides = [1, 1]} : vector<8x128xf32> to vector<8x32xf32>
    %312 = vector.extract_strided_slice %309 {offsets = [0, 64], sizes = [8, 32], strides = [1, 1]} : vector<8x128xf32> to vector<8x32xf32>
    %313 = vector.extract_strided_slice %308 {offsets = [0, 96], sizes = [8, 32], strides = [1, 1]} : vector<8x128xf32> to vector<8x32xf32>
    %314 = arith.mulf %311, %277 : vector<8x32xf32>
    %315 = arith.mulf %310, %312 : vector<8x32xf32>
    %316 = arith.addf %314, %315 : vector<8x32xf32>
    %317 = math.tanh %316 : vector<8x32xf32>
    %318 = arith.mulf %313, %317 : vector<8x32xf32>
    %c8_i32 = arith.constant 8 : i32
    %c0_63 = arith.constant 0 : index
    %c0_64 = arith.constant 0 : index
    %319 = vector.load %arg6[%c0_63, %c0_64] : memref<32x4xf32, #tpu.memory_space<vmem>>, vector<32x4xf32>
    %cst_65 = arith.constant dense<0.000000e+00> : vector<8x4xf32>
    %320 = tpu.matmul %318, %319, %cst_65 {dimension_numbers = #tpu.dot_dimension_numbers<[1], [0], [0], [1], [0, 0, 1, 1], [], []>} : vector<8x32xf32>, vector<32x4xf32>, vector<8x4xf32> -> vector<8x4xf32>
    %c0_66 = arith.constant 0 : index
    %c0_67 = arith.constant 0 : index
    %321 = vector.load %arg7[%c0_66, %c0_67] : memref<1x4xf32, #tpu.memory_space<vmem>>, vector<1x4xf32>
    %322 = vector.broadcast %321 : vector<1x4xf32> to vector<8x4xf32>
    %323 = arith.addf %320, %322 : vector<8x4xf32>
    %c0_68 = arith.constant 0 : index
    %c0_69 = arith.constant 0 : index
    %324 = vector.load %arg8[%c0_68, %c0_69] : memref<8x2xf32, #tpu.memory_space<vmem>>, vector<8x1xf32>
    %c0_70 = arith.constant 0 : index
    %c1 = arith.constant 1 : index
    %325 = vector.load %arg8[%c0_70, %c1] : memref<8x2xf32, #tpu.memory_space<vmem>>, vector<8x1xf32>
    %cst_71 = arith.constant 5.000000e-01 : f32
    %326 = vector.broadcast %cst_71 : f32 to vector<8x1xf32>
    %327 = arith.subf %324, %326 : vector<8x1xf32>
    %cst_72 = arith.constant 2.000000e+01 : f32
    %328 = vector.broadcast %cst_72 : f32 to vector<8x1xf32>
    %329 = arith.mulf %327, %328 : vector<8x1xf32>
    %cst_73 = arith.constant 5.000000e-01 : f32
    %330 = vector.broadcast %cst_73 : f32 to vector<8x1xf32>
    %331 = arith.subf %325, %330 : vector<8x1xf32>
    %cst_74 = arith.constant 1.000000e+01 : f32
    %332 = vector.broadcast %cst_74 : f32 to vector<8x1xf32>
    %333 = arith.mulf %331, %332 : vector<8x1xf32>
    %334 = arith.addf %329, %333 : vector<8x1xf32>
    %cst_75 = arith.constant 5.000000e-01 : f32
    %335 = vector.broadcast %cst_75 : f32 to vector<8x1xf32>
    %336 = arith.subf %324, %335 : vector<8x1xf32>
    %cst_76 = arith.constant 1.500000e+01 : f32
    %337 = vector.broadcast %cst_76 : f32 to vector<8x1xf32>
    %338 = arith.mulf %336, %337 : vector<8x1xf32>
    %cst_77 = arith.constant 5.000000e-01 : f32
    %339 = vector.broadcast %cst_77 : f32 to vector<8x1xf32>
    %340 = arith.subf %325, %339 : vector<8x1xf32>
    %cst_78 = arith.constant 7.500000e+00 : f32
    %341 = vector.broadcast %cst_78 : f32 to vector<8x1xf32>
    %342 = arith.mulf %340, %341 : vector<8x1xf32>
    %343 = arith.addf %338, %342 : vector<8x1xf32>
    %344 = arith.negf %323 : vector<8x4xf32>
    %345 = math.exp %344 : vector<8x4xf32>
    %cst_79 = arith.constant 1.000000e+00 : f32
    %346 = vector.broadcast %cst_79 : f32 to vector<8x4xf32>
    %347 = arith.addf %346, %345 : vector<8x4xf32>
    %348 = arith.divf %346, %347 : vector<8x4xf32>
    %cst_80 = arith.constant 8.000000e+01 : f32
    %349 = vector.broadcast %cst_80 : f32 to vector<8x4xf32>
    %350 = arith.mulf %348, %349 : vector<8x4xf32>
    %cst_81 = arith.constant 1.000000e+02 : f32
    %351 = vector.broadcast %cst_81 : f32 to vector<8x4xf32>
    %352 = arith.addf %350, %351 : vector<8x4xf32>
    %353 = vector.broadcast %334 : vector<8x1xf32> to vector<8x4xf32>
    %354 = arith.addf %352, %353 : vector<8x4xf32>
    %cst_82 = arith.constant 1.000000e+02 : f32
    %cst_83 = arith.constant 1.800000e+02 : f32
    %355 = vector.broadcast %cst_82 : f32 to vector<8x4xf32>
    %356 = arith.maximumf %355, %354 : vector<8x4xf32>
    %357 = vector.broadcast %cst_83 : f32 to vector<8x4xf32>
    %358 = arith.minimumf %357, %356 : vector<8x4xf32>
    %cst_84 = arith.constant 4.000000e+01 : f32
    %359 = vector.broadcast %cst_84 : f32 to vector<8x4xf32>
    %360 = arith.mulf %348, %359 : vector<8x4xf32>
    %361 = vector.broadcast %343 : vector<8x1xf32> to vector<8x4xf32>
    %362 = arith.addf %360, %361 : vector<8x4xf32>
    %cst_85 = arith.constant 0.000000e+00 : f32
    %cst_86 = arith.constant 4.000000e+01 : f32
    %363 = vector.broadcast %cst_85 : f32 to vector<8x4xf32>
    %364 = arith.maximumf %363, %362 : vector<8x4xf32>
    %365 = vector.broadcast %cst_86 : f32 to vector<8x4xf32>
    %366 = arith.minimumf %365, %364 : vector<8x4xf32>
    %367 = tpu.iota {dimensions = array<i32: 1>} : vector<8x4xi32>
    %c0_i32_87 = arith.constant 0 : i32
    %368 = vector.broadcast %c0_i32_87 : i32 to vector<8x4xi32>
    %369 = arith.cmpi eq, %367, %368 : vector<8x4xi32>
    %c1_i32_88 = arith.constant 1 : i32
    %370 = vector.broadcast %c1_i32_88 : i32 to vector<8x4xi32>
    %371 = arith.cmpi eq, %367, %370 : vector<8x4xi32>
    %372 = arith.select %371, %366, %323 : vector<8x4xi1>, vector<8x4xf32>
    %373 = arith.select %369, %358, %372 : vector<8x4xi1>, vector<8x4xf32>
    %c0_89 = arith.constant 0 : index
    %c0_90 = arith.constant 0 : index
    %374 = vector.load %arg9[%c0_89, %c0_90] : memref<8x4xf32, #tpu.memory_space<vmem>>, vector<8x4xf32>
    tpu.vector_store %arg9[%c0_89, %c0_90], %373 {strides = array<i32>} : memref<8x4xf32, #tpu.memory_space<vmem>>, vector<8x4xf32>,
    return
  }
  func.func @transform_0(%arg0: i32) -> (i32, i32, i32) {
    %c0_i32 = arith.constant 0 : i32
    %c0_i32_0 = arith.constant 0 : i32
    %c0_i32_1 = arith.constant 0 : i32
    return %c0_i32, %arg0, %c0_i32_0 : i32, i32, i32
  }
  func.func @transform_1(%arg0: i32) -> (i32, i32) {
    %c0_i32 = arith.constant 0 : i32
    %c0_i32_0 = arith.constant 0 : i32
    %c0_i32_1 = arith.constant 0 : i32
    return %c0_i32, %c0_i32_0 : i32, i32
  }
  func.func @transform_2(%arg0: i32) -> (i32, i32) {
    %c0_i32 = arith.constant 0 : i32
    %c0_i32_0 = arith.constant 0 : i32
    %c0_i32_1 = arith.constant 0 : i32
    return %c0_i32, %c0_i32_0 : i32, i32
  }
  func.func @transform_3(%arg0: i32) -> (i32, i32) {
    %c0_i32 = arith.constant 0 : i32
    %c0_i32_0 = arith.constant 0 : i32
    %c0_i32_1 = arith.constant 0 : i32
    return %c0_i32, %c0_i32_0 : i32, i32
  }
  func.func @transform_4(%arg0: i32) -> (i32, i32) {
    %c0_i32 = arith.constant 0 : i32
    %c0_i32_0 = arith.constant 0 : i32
    %c0_i32_1 = arith.constant 0 : i32
    return %c0_i32, %c0_i32_0 : i32, i32
  }
  func.func @transform_5(%arg0: i32) -> (i32, i32) {
    %c0_i32 = arith.constant 0 : i32
    %c0_i32_0 = arith.constant 0 : i32
    %c0_i32_1 = arith.constant 0 : i32
    return %c0_i32, %c0_i32_0 : i32, i32
  }
  func.func @transform_6(%arg0: i32) -> (i32, i32) {
    %c0_i32 = arith.constant 0 : i32
    %c0_i32_0 = arith.constant 0 : i32
    %c0_i32_1 = arith.constant 0 : i32
    return %c0_i32, %c0_i32_0 : i32, i32
  }
  func.func @transform_7(%arg0: i32) -> (i32, i32) {
    %c0_i32 = arith.constant 0 : i32
    %c0_i32_0 = arith.constant 0 : i32
    return %arg0, %c0_i32 : i32, i32
  }
  func.func @transform_8(%arg0: i32) -> (i32, i32) {
    %c0_i32 = arith.constant 0 : i32
    %c0_i32_0 = arith.constant 0 : i32
    return %arg0, %c0_i32 : i32, i32
  }
}

</mosaic_0001>

<bundles_post_ra>
// kernel: tpu_custom_call.1
= control target key start
LH: loop header
LB: loop body
LE: loop exit
PB: predicated region body
PF: predicated region fallthrough
CT: control target
= control target key end

     0   :  { %13 = vsyncpa [#allocation3], 0  ;;  %s3669_s0 = inlined_call_operand.hbm [shape: f32[8,8,128], index: 0, kind: input, shape index: {}]   ;;  %s3670_s1 = inlined_call_operand.vmem [shape: f32[32,128], index: 1, kind: input, shape index: {}]   ;;  %s3671_s2 = inlined_call_operand.hbm [shape: f32[32,128], index: 2, kind: input, shape index: {}]   ;;  %s3672_s3 = inlined_call_operand.hbm [shape: f32[32,128], index: 3, kind: input, shape index: {}]   ;;  %s3673_s4 = inlined_call_operand.vmem [shape: f32[1,128], index: 4, kind: input, shape index: {}]   ;;  %s3674_s5 = inlined_call_operand.vmem [shape: f32[32,4], index: 5, kind: input, shape index: {}]   ;;  %s3675_s6 = inlined_call_operand.vmem [shape: f32[1,4], index: 6, kind: input, shape index: {}]   ;;  %s3676_s7 = inlined_call_operand.vmem [shape: f32[8,2], index: 7, kind: input, shape index: {}]   ;;  %s3677_s8 = inlined_call_operand.vmem [shape: f32[8,4], index: 8, kind: output, shape index: {}]  }
   0x1   :  { %14 = vsyncpa [#allocation5], 0  ;;  %s3213_s27 = smov [#allocation4]   ;;  %s3214_s29 = smov [#allocation2]  }
   0x2   :  { %s34_s28 = sshll.u32 %s3213_s27, 4  ;;  %s20_s30 = sshll.u32 %s3214_s29, 4  ;;  %s35_s28 = int_to_ptr.vmem [resolvable:$true] %s34_s28  ;;  %s3270_s30 = int_to_ptr.vmem [resolvable:$true] %s20_s30 }
   0x3   :  { %s3143_s11 = scalar_lea.hbm %s3671_s2, 512 }
   0x4   :  { %p3144_p0 = scmp.ne.s32.totalorder %s3671_s2, %s3143_s11  ;;  %p3147_p1 = scmp.lt.u32.totalorder %s3143_s11, %s3671_s2 }
   0x6   :  { %p3149_p2 = pnand %p3147_p1, %p3144_p0 }
   0x8   :  { %3152 = shalt.err (!%p3149_p2)
}
   0x9   :  { %s3153_s16 = scalar_lea.vmem %s35_s28, 512  ;;  %p3158_p4 = scmp.lt.s32.totalorder %s35_s28, %s35_s28 }
   0xa   :  { %p3154_p3 = scmp.ne.s32.totalorder %s35_s28, %s3153_s16  ;;  %p3159_p5 = scmp.lt.s32.totalorder %s3153_s16, %s3153_s16 }
   0xc   :  { %p3160_p6 = por %p3159_p5, %p3158_p4 }
   0xe   :  { %p3161_p7 = pnand %p3160_p6, %p3154_p3 }
  0x10   :  { %3164 = shalt.err (!%p3161_p7)
}
  0x11   :  { %s3215_s17 = smov 128   ;;  %s3216_s18 = smov 8  }
  0x12   :  { %40 = dma.hbm_to_vmem [thread:$0]  %s3671_s2, 512, %s35_s28, [#allocation5], %s3215_s17, %s3215_s17, %s3216_s18  }
  0x13   :  { %s3165_s23 = scalar_lea.hbm %s3669_s0, 1024 }
  0x14   :  { %p3166_p8 = scmp.ne.s32.totalorder %s3669_s0, %s3165_s23  ;;  %p3169_p9 = scmp.lt.u32.totalorder %s3165_s23, %s3669_s0 }
  0x16   :  { %p3171_p10 = pnand %p3169_p9, %p3166_p8 }
  0x18   :  { %3174 = shalt.err (!%p3171_p10)
}
  0x19   :  { %s3175_s29 = scalar_lea.vmem %s3270_s30, 1024  ;;  %p3180_p12 = scmp.lt.s32.totalorder %s3270_s30, %s3270_s30 }
  0x1a   :  { %p3176_p11 = scmp.ne.s32.totalorder %s3270_s30, %s3175_s29  ;;  %p3181_p13 = scmp.lt.s32.totalorder %s3175_s29, %s3175_s29 }
  0x1c   :  { %p3182_p0 = por %p3181_p13, %p3180_p12 }
  0x1e   :  { %p3183_p1 = pnand %p3182_p0, %p3176_p11 }
  0x20   :  { %3186 = shalt.err (!%p3183_p1)
}
  0x21   :  { %26 = dma.hbm_to_vmem [thread:$0]  %s3669_s0, 1024, %s3270_s30, [#allocation3], %s3215_s17, %s3215_s17, %s3216_s18  }
  0x22   :  { %s3217_s9 = smov [#allocation6]   ;;  %s3187_s13 = scalar_lea.hbm %s3672_s3, 512 }
  0x23   :  { %s46_s10 = sshll.u32 %s3217_s9, 4  ;;  %p3188_p2 = scmp.ne.s32.totalorder %s3672_s3, %s3187_s13  ;;  %s47_s10 = int_to_ptr.vmem [resolvable:$true] %s46_s10 }
  0x24   :  { %p3191_p3 = scmp.lt.u32.totalorder %s3187_s13, %s3672_s3 }
  0x26   :  { %p3193_p4 = pnand %p3191_p3, %p3188_p2 }
  0x28   :  { %3196 = shalt.err (!%p3193_p4)
}
  0x29   :  { %s3197_s20 = scalar_lea.vmem %s47_s10, 512  ;;  %p3202_p6 = scmp.lt.s32.totalorder %s47_s10, %s47_s10 }
  0x2a   :  { %p3198_p5 = scmp.ne.s32.totalorder %s47_s10, %s3197_s20  ;;  %p3203_p7 = scmp.lt.s32.totalorder %s3197_s20, %s3197_s20 }
  0x2c   :  { %p3204_p8 = por %p3203_p7, %p3202_p6 }
  0x2e   :  { %p3205_p9 = pnand %p3204_p8, %p3198_p5 }
  0x30   :  { %3208 = shalt.err (!%p3205_p9)
}
  0x31   :  { %52 = dma.hbm_to_vmem [thread:$0]  %s3672_s3, 512, %s47_s10, [#allocation5], %s3215_s17, %s3215_s17, %s3216_s18  }
  0x32   :  { %3209 = dma.done.wait [#allocation3], 1024  }
  0x33   :  { %3210 = vsyncadd [#allocation3], 4294966272 }
  0x34   :  { %3211 = dma.done.wait [#allocation5], 1024  }
  0x35   :  { %3212 = vsyncadd [#allocation5], 4294966272  ;;  %v3218_v0 = vmov 0.0|0.0   ;;  %vm3219_vm0 = vmmov 0   ;;  %v3220_v1 = vmov 0.0   ;;  %v70_v2 = vld [vmem:[%s3670_s1] sm:$0xff] }
  0x36   :  { %2847 = vmatprep.subr.bf16.mxu0 %v3218_v0  ;;  %2580 = vmatprep.mubr.msk.f32.mxu0 %vm3219_vm0, %v3220_v1  ;;  %v71_v3 = vld [vmem:[%s3670_s1 + $0x8] sm:$0xff]  ;;  %v72_v4 = vld [vmem:[%s3670_s1 + $0x10] sm:$0xff]  ;;  %v73_v6 = vld [vmem:[%s3670_s1 + $0x18] sm:$0xff]  ;;  %s3221_s1 = smov 64   ;;  %s3222_s26 = smov 32   ;;  %vm90_vm1 = vcmask 261120  }
  0x37   :  { %2853 = vmatprep.subr.bf16.mxu1 %v3218_v0  ;;  %2591 = vmatprep.mubr.msk.f32.mxu1 %vm3219_vm0, %v3220_v1  ;;  %v3337_v5 = vpack.c.bf16 %v71_v3, %v70_v2  ;;  %v3343_v7 = vpack.c.bf16 %v73_v6, %v72_v4  ;;  %v89_v8 = vld [vmem:[#allocation2] sm:$0xff]  ;;  %v79_v23 = vld [vmem:[#allocation6 + $0x8] sm:$0xff]  ;;  %v80_v24 = vld [vmem:[#allocation6 + $0x10] sm:$0xff]  ;;  %s3223_s16 = smov 127   ;;  %vm2396_vm4 = vcmask 31744  }
  0x38   :  { %v78_v22 = vld [vmem:[#allocation6] sm:$0xff]  ;;  %v81_v26 = vld [vmem:[#allocation6 + $0x18] sm:$0xff]  ;;  %v75_v28 = vld [vmem:[#allocation4 + $0x8] sm:$0xff] }
  0x39   :  { %2849 = vmatpush3.bf16.msra.mxu0 %v3337_v5  ;;  %v3356_v25 = vpack.c.bf16 %v79_v23, %v78_v22  ;;  %v74_v27 = vld [vmem:[#allocation4] sm:$0xff]  ;;  %v76_v30 = vld [vmem:[#allocation4 + $0x10] sm:$0xff]  ;;  %v77_v31 = vld [vmem:[#allocation4 + $0x18] sm:$0xff]  ;;  %v3361_v32 = vpack.c.bf16 %v81_v26, %v80_v24 }
  0x3a   :  { %2850 = vmatprep.subr.bf16.mxu0 %v3218_v0  ;;  %v3358_v29 = vpack.c.bf16 %v75_v28, %v74_v27  ;;  %v3365_v33 = vpack.c.bf16 %v77_v31, %v76_v30  ;;  %v360_v40 = vld [vmem:[#allocation2 + $0x8] sm:$0xff]  ;;  %v3398_v41 = vld [vmem:[%s3673_s4] ss:$0 sm:$0xff]  ;;  %v632_v23 = vld [vmem:[#allocation2 + $0x10] sm:$0xff] }
  0x3b   :  { %2855 = vmatpush3.bf16.msra.mxu1 %v3356_v25 }
  0x3c   :  { %2856 = vmatprep.subr.bf16.mxu1 %v3218_v0 }
  0x3d   :  { %2852 = vmatpush3.bf16.msra.mxu0 %v3343_v7 }
  0x3e   :  { %2859 = vmatprep.subr.bf16.mxu0 %v3218_v0 }
  0x3f   :  { %2858 = vmatpush3.bf16.msra.mxu1 %v3361_v32 }
  0x40   :  { %2581 = vmatmul.mubr.f32.vlgmr.msra.gmra.mrb[0].mxu0 %v3220_v1  ;;  %2865 = vmatprep.subr.bf16.mxu1 %v3218_v0 }
  0x41   :  { %2602 = vmatprep.mubr.msk.f32.mxu0 %vm3219_vm0, %v3220_v1  ;;  %2861 = vmatpush3.bf16.msra.mxu0 %v3358_v29 }
  0x42   :  { %2862 = vmatprep.subr.bf16.mxu0 %v3218_v0  ;;  %2592 = vmatmul.mubr.f32.vlgmr.msra.gmra.mrb[0].mxu1 %v3220_v1 }
  0x43   :  { %2867 = vmatpush3.bf16.msra.mxu1 %v3337_v5  ;;  %2613 = vmatprep.mubr.msk.f32.mxu1 %vm3219_vm0, %v3220_v1 }
  0x44   :  { %2868 = vmatprep.subr.bf16.mxu1 %v3218_v0 }
  0x45   :  { %2864 = vmatpush3.bf16.msra.mxu0 %v3365_v33 }
  0x46   :  { %2871 = vmatprep.subr.bf16.mxu0 %v3218_v0 }
  0x47   :  { %2870 = vmatpush3.bf16.msra.mxu1 %v3343_v7 }
  0x48   :  { %2877 = vmatprep.subr.bf16.mxu1 %v3218_v0 }
 0x113   :  { %v160_v9 = vpop.f32.mrb[0].mxu0 }
 0x114   :  { %v164_v10 = vadd.f32 %v160_v9, %v89_v8  ;;  %v2582_v11 = vpop.f32.mrb[1].mxu0 }
 0x115   :  { %v255_v37 = vpop.f32.mrb[0].mxu1 }
 0x116   :  { %3011 = vtanh.f32 %v164_v10  ;;  %v2405_v13 = vmul.f32 -1.442695, %v164_v10  ;;  %v2593_v38 = vpop.f32.mrb[1].mxu1 }
 0x118   :  { %3013 = vpow2.f32 %v2405_v13 }
 0x120   :  { %v3012_v12 = vpop.eup %3011 }
 0x121   :  { %174 = vrot.lane.b32.xlu0 %v3012_v12, %s3221_s1 }
 0x122   :  { %v3014_v14 = vpop.eup %3013 }
 0x123   :  { %v168_v15 = vadd.f32 1.0, %v3014_v14 }
 0x125   :  { %3015 = vrcp.f32 %v168_v15 }
 0x12f   :  { %v3016_v16 = vpop.eup %3015 }
 0x130   :  { %v172_v19 = vmul.f32 0.0, %v3016_v16 }
 0x193   :  { %v175_v17 = vpop.permute.xlu0 %174 }
 0x194   :  { %v177_v18 = vmul.f32 %v3016_v16, %v175_v17 }
 0x196   :  { %179 = vrot.lane.b32.xlu0 %v177_v18, %s3222_s26 }
 0x208   :  { %v180_v20 = vpop.permute.xlu0 %179 }
 0x209   :  { %v3353_v21 = vadd.f32 %v180_v20, %v172_v19 }
 0x20b   :  { %3017 = vtanh.f32 %v3353_v21 }
 0x215   :  { %v3018_v34 = vpop.eup %3017 }
 0x216   :  { %185 = vrot.lane.b32.xlu1 %v3018_v34, %s3221_s1 }
 0x288   :  { %v186_v35 = vpop.permute.xlu1 %185 }
 0x289   :  { %v188_v36 = vmul.f32 %v3016_v16, %v186_v35 }
 0x28b   :  { %260 = vrot.lane.b32.xlu1 %v188_v36, %s3222_s26 }
 0x2fd   :  { %v261_v39 = vpop.permute.xlu1 %260 }
 0x2fe   :  { %2603 = vmatmul.mubr.msk.f32.vlgmr.msra.gmra.mrb[2].mxu0 %vm90_vm1, %v261_v39  ;;  %2614 = vmatmul.mubr.msk.f32.vlgmr.msra.gmra.mrb[2].mxu1 %vm90_vm1, %v261_v39 }
 0x2ff   :  { %2879 = vmatpush3.bf16.msra.mxu1 %v3358_v29  ;;  %2873 = vmatpush3.bf16.msra.mxu0 %v3356_v25 }
 0x300   :  { %2880 = vmatprep.subr.bf16.mxu1 %v3218_v0  ;;  %2874 = vmatprep.subr.bf16.mxu0 %v3218_v0 }
 0x301   :  { %2635 = vmatprep.mubr.msk.f32.mxu1 %vm3219_vm0, %v3220_v1  ;;  %2624 = vmatprep.mubr.msk.f32.mxu0 %vm3219_vm0, %v3220_v1 }
 0x303   :  { %2882 = vmatpush3.bf16.msra.mxu1 %v3365_v33  ;;  %2876 = vmatpush3.bf16.msra.mxu0 %v3361_v32 }
 0x304   :  { %2883 = vmatprep.subr.bf16.mxu0 %v3218_v0  ;;  %2889 = vmatprep.subr.bf16.mxu1 %v3218_v0 }
 0x3d1   :  { %v330_v42 = vpop.f32.mrb[2].mxu0  ;;  %v427_v43 = vpop.f32.mrb[2].mxu1 }
 0x3d2   :  { %v331_v44 = vadd.f32 %v330_v42, %v255_v37  ;;  %v431_v45 = vadd.f32 %v427_v43, %v360_v40  ;;  %v2604_v46 = vpop.f32.mrb[3].mxu0  ;;  %v2615_v47 = vpop.f32.mrb[3].mxu1 }
 0x3d4   :  { %v334_v48 = vadd.f32 %v3398_v41, %v331_v44  ;;  %3019 = vtanh.f32 %v431_v45  ;;  %v2409_v51 = vmul.f32 -1.442695, %v431_v45 }
 0x3d6   :  { %3021 = vtanh.f32 %v334_v48  ;;  %v2407_v52 = vmul.f32 -1.442695, %v334_v48 }
 0x3d7   :  { %3023 = vpow2.f32 %v2409_v51 }
 0x3d8   :  { %3025 = vpow2.f32 %v2407_v52 }
 0x3de   :  { %v3020_v49 = vpop.eup %3019 }
 0x3df   :  { %441 = vrot.lane.b32.xlu1 %v3020_v49, %s3221_s1 }
 0x3e0   :  { %v3022_v50 = vpop.eup %3021 }
 0x3e1   :  { %344 = vrot.lane.b32.xlu0 %v3022_v50, %s3221_s1  ;;  %v3024_v53 = vpop.eup %3023 }
 0x3e2   :  { %v3026_v54 = vpop.eup %3025  ;;  %v435_v55 = vadd.f32 1.0, %v3024_v53 }
 0x3e3   :  { %v338_v56 = vadd.f32 1.0, %v3026_v54 }
 0x3e4   :  { %3027 = vrcp.f32 %v435_v55 }
 0x3e5   :  { %3029 = vrcp.f32 %v338_v56 }
 0x3ee   :  { %v3028_v57 = vpop.eup %3027 }
 0x3ef   :  { %v3030_v60 = vpop.eup %3029  ;;  %v439_v63 = vmul.f32 %v3028_v57, %v3353_v21 }
 0x3f0   :  { %v342_v4 = vmul.f32 0.0, %v3030_v60 }
 0x451   :  { %v442_v58 = vpop.permute.xlu1 %441 }
 0x452   :  { %v444_v59 = vmul.f32 %v3028_v57, %v442_v58 }
 0x453   :  { %v345_v61 = vpop.permute.xlu0 %344 }
 0x454   :  { %v347_v62 = vmul.f32 %v3030_v60, %v345_v61  ;;  %446 = vrot.lane.b32.xlu1 %v444_v59, %s3222_s26 }
 0x456   :  { %349 = vrot.lane.b32.xlu0 %v347_v62, %s3222_s26 }
 0x4c6   :  { %v447_v2 = vpop.permute.xlu1 %446 }
 0x4c7   :  { %v3406_v3 = vadd.f32 %v447_v2, %v439_v63  ;;  %v904_v63 = vld [vmem:[#allocation2 + $0x18] sm:$0xff] }
 0x4c8   :  { %v350_v6 = vpop.permute.xlu0 %349 }
 0x4c9   :  { %3031 = vtanh.f32 %v3406_v3  ;;  %v3409_v8 = vadd.f32 %v350_v6, %v342_v4 }
 0x4cb   :  { %3033 = vtanh.f32 %v3409_v8 }
 0x4d3   :  { %v3032_v9 = vpop.eup %3031 }
 0x4d4   :  { %452 = vrot.lane.b32.xlu1 %v3032_v9, %s3221_s1 }
 0x4d5   :  { %v3034_v10 = vpop.eup %3033 }
 0x4d6   :  { %355 = vrot.lane.b32.xlu0 %v3034_v10, %s3221_s1 }
 0x546   :  { %v453_v11 = vpop.permute.xlu1 %452 }
 0x547   :  { %v455_v12 = vmul.f32 %v3028_v57, %v453_v11 }
 0x548   :  { %v356_v13 = vpop.permute.xlu0 %355 }
 0x549   :  { %v358_v14 = vmul.f32 %v3030_v60, %v356_v13  ;;  %532 = vrot.lane.b32.xlu1 %v455_v12, %s3222_s26 }
 0x54b   :  { %457 = vrot.lane.b32.xlu0 %v358_v14, %s3222_s26 }
 0x5bb   :  { %v533_v15 = vpop.permute.xlu1 %532 }
 0x5bc   :  { %2636 = vmatmul.mubr.msk.f32.vlgmr.msra.gmra.mrb[4].mxu1 %vm90_vm1, %v533_v15 }
 0x5bd   :  { %v458_v16 = vpop.permute.xlu0 %457  ;;  %2891 = vmatpush3.bf16.msra.mxu1 %v3356_v25  ;;  %2657 = vmatprep.mubr.msk.f32.mxu1 %vm3219_vm0, %v3220_v1 }
 0x5be   :  { %2625 = vmatmul.mubr.msk.f32.vlgmr.msra.gmra.mrb[4].mxu0 %vm90_vm1, %v458_v16  ;;  %2892 = vmatprep.subr.bf16.mxu1 %v3218_v0 }
 0x5bf   :  { %2885 = vmatpush3.bf16.msra.mxu0 %v3337_v5  ;;  %2646 = vmatprep.mubr.msk.f32.mxu0 %vm3219_vm0, %v3220_v1 }
 0x5c0   :  { %2886 = vmatprep.subr.bf16.mxu0 %v3218_v0 }
 0x5c1   :  { %2894 = vmatpush3.bf16.msra.mxu1 %v3361_v32 }
 0x5c2   :  { %2901 = vmatprep.subr.bf16.mxu1 %v3218_v0 }
 0x5c3   :  { %2888 = vmatpush3.bf16.msra.mxu0 %v3343_v7 }
 0x5c4   :  { %2895 = vmatprep.subr.bf16.mxu0 %v3218_v0 }
 0x5c6   :  { %2647 = vmatmul.mubr.msk.f32.vlgmr.msra.gmra.mrb[6].mxu0 %vm90_vm1, %v533_v15 }
 0x5c7   :  { %2897 = vmatpush3.bf16.msra.mxu0 %v3358_v29  ;;  %2668 = vmatprep.mubr.msk.f32.mxu0 %vm3219_vm0, %v3220_v1 }
 0x5c8   :  { %2898 = vmatprep.subr.bf16.mxu0 %v3218_v0 }
 0x5cb   :  { %2900 = vmatpush3.bf16.msra.mxu0 %v3365_v33 }
 0x5cc   :  { %2907 = vmatprep.subr.bf16.mxu0 %v3218_v0 }
 0x68f   :  { %v602_v17 = vpop.f32.mrb[4].mxu1 }
 0x690   :  { %v2637_v18 = vpop.f32.mrb[5].mxu1 }
 0x691   :  { %v527_v19 = vpop.f32.mrb[4].mxu0 }
 0x692   :  { %v603_v20 = vadd.f32 %v602_v17, %v527_v19  ;;  %v2626_v21 = vpop.f32.mrb[5].mxu0 }
 0x694   :  { %v606_v22 = vadd.f32 %v3398_v41, %v603_v20 }
 0x696   :  { %3035 = vtanh.f32 %v606_v22  ;;  %v2412_v31 = vmul.f32 -1.442695, %v606_v22 }
 0x699   :  { %v699_v24 = vpop.f32.mrb[6].mxu0 }
 0x69a   :  { %v703_v26 = vadd.f32 %v699_v24, %v632_v23  ;;  %v2648_v27 = vpop.f32.mrb[7].mxu0 }
 0x69c   :  { %3037 = vtanh.f32 %v703_v26  ;;  %v2414_v34 = vmul.f32 -1.442695, %v703_v26 }
 0x69d   :  { %3039 = vpow2.f32 %v2412_v31 }
 0x69e   :  { %3041 = vpow2.f32 %v2414_v34 }
 0x6a0   :  { %v3036_v28 = vpop.eup %3035 }
 0x6a1   :  { %616 = vrot.lane.b32.xlu0 %v3036_v28, %s3221_s1 }
 0x6a6   :  { %v3038_v30 = vpop.eup %3037 }
 0x6a7   :  { %713 = vrot.lane.b32.xlu1 %v3038_v30, %s3221_s1  ;;  %v3040_v35 = vpop.eup %3039 }
 0x6a8   :  { %v610_v36 = vadd.f32 1.0, %v3040_v35  ;;  %v3042_v37 = vpop.eup %3041 }
 0x6a9   :  { %v707_v38 = vadd.f32 1.0, %v3042_v37 }
 0x6aa   :  { %3043 = vrcp.f32 %v610_v36 }
 0x6ab   :  { %3045 = vrcp.f32 %v707_v38 }
 0x6b4   :  { %v3044_v39 = vpop.eup %3043 }
 0x6b5   :  { %v3046_v43 = vpop.eup %3045  ;;  %v614_v46 = vmul.f32 %v3044_v39, %v3409_v8 }
 0x6b6   :  { %v711_v49 = vmul.f32 %v3046_v43, %v3406_v3 }
 0x713   :  { %v617_v40 = vpop.permute.xlu0 %616 }
 0x714   :  { %v619_v42 = vmul.f32 %v3044_v39, %v617_v40 }
 0x716   :  { %621 = vrot.lane.b32.xlu0 %v619_v42, %s3222_s26 }
 0x719   :  { %v714_v44 = vpop.permute.xlu1 %713 }
 0x71a   :  { %v716_v45 = vmul.f32 %v3046_v43, %v714_v44 }
 0x71c   :  { %718 = vrot.lane.b32.xlu1 %v716_v45, %s3222_s26 }
 0x788   :  { %v622_v47 = vpop.permute.xlu0 %621 }
 0x789   :  { %v3443_v48 = vadd.f32 %v622_v47, %v614_v46 }
 0x78b   :  { %3047 = vtanh.f32 %v3443_v48 }
 0x78e   :  { %v719_v50 = vpop.permute.xlu1 %718 }
 0x78f   :  { %v3447_v51 = vadd.f32 %v719_v50, %v711_v49  ;;  %v1176_v49 = vld [vmem:[#allocation2 + $0x20] sm:$0xff] }
 0x791   :  { %3049 = vtanh.f32 %v3447_v51 }
 0x795   :  { %v3048_v52 = vpop.eup %3047 }
 0x796   :  { %627 = vrot.lane.b32.xlu0 %v3048_v52, %s3221_s1 }
 0x79b   :  { %v3050_v53 = vpop.eup %3049 }
 0x79c   :  { %724 = vrot.lane.b32.xlu1 %v3050_v53, %s3221_s1 }
 0x808   :  { %v628_v54 = vpop.permute.xlu0 %627 }
 0x809   :  { %v630_v55 = vmul.f32 %v3044_v39, %v628_v54 }
 0x80b   :  { %729 = vrot.lane.b32.xlu0 %v630_v55, %s3222_s26 }
 0x80e   :  { %v725_v56 = vpop.permute.xlu1 %724 }
 0x80f   :  { %v727_v57 = vmul.f32 %v3046_v43, %v725_v56 }
 0x811   :  { %804 = vrot.lane.b32.xlu1 %v727_v57, %s3222_s26 }
 0x87d   :  { %v730_v58 = vpop.permute.xlu0 %729 }
 0x87e   :  { %2658 = vmatmul.mubr.msk.f32.vlgmr.msra.gmra.mrb[6].mxu1 %vm90_vm1, %v730_v58 }
 0x87f   :  { %2903 = vmatpush3.bf16.msra.mxu1 %v3337_v5  ;;  %2679 = vmatprep.mubr.msk.f32.mxu1 %vm3219_vm0, %v3220_v1 }
 0x880   :  { %2904 = vmatprep.subr.bf16.mxu1 %v3218_v0 }
 0x883   :  { %2906 = vmatpush3.bf16.msra.mxu1 %v3343_v7  ;;  %v805_v59 = vpop.permute.xlu1 %804 }
 0x884   :  { %2669 = vmatmul.mubr.msk.f32.vlgmr.msra.gmra.mrb[8].mxu0 %vm90_vm1, %v805_v59  ;;  %2913 = vmatprep.subr.bf16.mxu1 %v3218_v0 }
 0x885   :  { %2909 = vmatpush3.bf16.msra.mxu0 %v3356_v25  ;;  %2690 = vmatprep.mubr.msk.f32.mxu0 %vm3219_vm0, %v3220_v1 }
 0x886   :  { %2680 = vmatmul.mubr.msk.f32.vlgmr.msra.gmra.mrb[8].mxu1 %vm90_vm1, %v805_v59  ;;  %2910 = vmatprep.subr.bf16.mxu0 %v3218_v0 }
 0x887   :  { %2915 = vmatpush3.bf16.msra.mxu1 %v3358_v29  ;;  %2701 = vmatprep.mubr.msk.f32.mxu1 %vm3219_vm0, %v3220_v1 }
 0x888   :  { %2916 = vmatprep.subr.bf16.mxu1 %v3218_v0 }
 0x889   :  { %2912 = vmatpush3.bf16.msra.mxu0 %v3361_v32 }
 0x88a   :  { %2919 = vmatprep.subr.bf16.mxu0 %v3218_v0 }
 0x88b   :  { %2918 = vmatpush3.bf16.msra.mxu1 %v3365_v33 }
 0x88c   :  { %2925 = vmatprep.subr.bf16.mxu1 %v3218_v0 }
 0x951   :  { %v799_v60 = vpop.f32.mrb[6].mxu1 }
 0x952   :  { %v2659_v61 = vpop.f32.mrb[7].mxu1 }
 0x957   :  { %v874_v62 = vpop.f32.mrb[8].mxu0 }
 0x958   :  { %v875_v2 = vadd.f32 %v874_v62, %v799_v60  ;;  %v2670_v3 = vpop.f32.mrb[9].mxu0 }
 0x959   :  { %v971_v4 = vpop.f32.mrb[8].mxu1 }
 0x95a   :  { %v878_v6 = vadd.f32 %v3398_v41, %v875_v2  ;;  %v975_v8 = vadd.f32 %v971_v4, %v904_v63  ;;  %v2681_v9 = vpop.f32.mrb[9].mxu1 }
 0x95c   :  { %3051 = vtanh.f32 %v878_v6  ;;  %v2417_v12 = vmul.f32 -1.442695, %v878_v6  ;;  %v2419_v13 = vmul.f32 -1.442695, %v975_v8 }
 0x95d   :  { %3053 = vtanh.f32 %v975_v8 }
 0x95e   :  { %3055 = vpow2.f32 %v2417_v12 }
 0x95f   :  { %3057 = vpow2.f32 %v2419_v13 }
 0x966   :  { %v3052_v10 = vpop.eup %3051 }
 0x967   :  { %v3054_v11 = vpop.eup %3053  ;;  %888 = vrot.lane.b32.xlu0 %v3052_v10, %s3221_s1 }
 0x968   :  { %985 = vrot.lane.b32.xlu1 %v3054_v11, %s3221_s1  ;;  %v3056_v14 = vpop.eup %3055 }
 0x969   :  { %v3058_v15 = vpop.eup %3057  ;;  %v882_v16 = vadd.f32 1.0, %v3056_v14 }
 0x96a   :  { %v979_v17 = vadd.f32 1.0, %v3058_v15 }
 0x96b   :  { %3059 = vrcp.f32 %v882_v16 }
 0x96c   :  { %3061 = vrcp.f32 %v979_v17 }
 0x975   :  { %v3060_v18 = vpop.eup %3059 }
 0x976   :  { %v3062_v20 = vpop.eup %3061  ;;  %v886_v24 = vmul.f32 %v3060_v18, %v3443_v48 }
 0x977   :  { %v983_v26 = vmul.f32 %v3062_v20, %v3447_v51 }
 0x9d9   :  { %v889_v19 = vpop.permute.xlu0 %888 }
 0x9da   :  { %v986_v21 = vpop.permute.xlu1 %985  ;;  %v891_v22 = vmul.f32 %v3060_v18, %v889_v19 }
 0x9db   :  { %v988_v23 = vmul.f32 %v3062_v20, %v986_v21 }
 0x9dc   :  { %893 = vrot.lane.b32.xlu0 %v891_v22, %s3222_s26 }
 0x9dd   :  { %990 = vrot.lane.b32.xlu1 %v988_v23, %s3222_s26 }
 0xa4e   :  { %v894_v27 = vpop.permute.xlu0 %893 }
 0xa4f   :  { %v991_v28 = vpop.permute.xlu1 %990  ;;  %v3482_v30 = vadd.f32 %v894_v27, %v886_v24  ;;  %v1448_v27 = vld [vmem:[#allocation2 + $0x28] sm:$0xff] }
 0xa50   :  { %v3484_v31 = vadd.f32 %v991_v28, %v983_v26 }
 0xa51   :  { %3063 = vtanh.f32 %v3482_v30 }
 0xa52   :  { %3065 = vtanh.f32 %v3484_v31 }
 0xa5b   :  { %v3064_v34 = vpop.eup %3063 }
 0xa5c   :  { %v3066_v35 = vpop.eup %3065  ;;  %899 = vrot.lane.b32.xlu0 %v3064_v34, %s3221_s1 }
 0xa5d   :  { %996 = vrot.lane.b32.xlu1 %v3066_v35, %s3221_s1 }
 0xace   :  { %v900_v36 = vpop.permute.xlu0 %899 }
 0xacf   :  { %v997_v37 = vpop.permute.xlu1 %996  ;;  %v902_v38 = vmul.f32 %v3060_v18, %v900_v36 }
 0xad0   :  { %v999_v39 = vmul.f32 %v3062_v20, %v997_v37 }
 0xad1   :  { %1001 = vrot.lane.b32.xlu0 %v902_v38, %s3222_s26 }
 0xad2   :  { %1076 = vrot.lane.b32.xlu1 %v999_v39, %s3222_s26 }
 0xb43   :  { %v1002_v40 = vpop.permute.xlu0 %1001 }
 0xb44   :  { %v1077_v42 = vpop.permute.xlu1 %1076  ;;  %2691 = vmatmul.mubr.msk.f32.vlgmr.msra.gmra.mrb[10].mxu0 %vm90_vm1, %v1002_v40 }
 0xb45   :  { %2702 = vmatmul.mubr.msk.f32.vlgmr.msra.gmra.mrb[10].mxu1 %vm90_vm1, %v1077_v42  ;;  %2921 = vmatpush3.bf16.msra.mxu0 %v3337_v5 }
 0xb46   :  { %2922 = vmatprep.subr.bf16.mxu0 %v3218_v0  ;;  %2712 = vmatprep.mubr.msk.f32.mxu0 %vm3219_vm0, %v3220_v1 }
 0xb47   :  { %2927 = vmatpush3.bf16.msra.mxu1 %v3356_v25  ;;  %2723 = vmatprep.mubr.msk.f32.mxu1 %vm3219_vm0, %v3220_v1 }
 0xb48   :  { %2928 = vmatprep.subr.bf16.mxu1 %v3218_v0 }
 0xb49   :  { %2924 = vmatpush3.bf16.msra.mxu0 %v3343_v7 }
 0xb4a   :  { %2931 = vmatprep.subr.bf16.mxu0 %v3218_v0 }
 0xb4b   :  { %2930 = vmatpush3.bf16.msra.mxu1 %v3361_v32 }
 0xb4c   :  { %2713 = vmatmul.mubr.msk.f32.vlgmr.msra.gmra.mrb[12].mxu0 %vm90_vm1, %v1077_v42  ;;  %2937 = vmatprep.subr.bf16.mxu1 %v3218_v0 }
 0xb4d   :  { %2933 = vmatpush3.bf16.msra.mxu0 %v3358_v29  ;;  %2734 = vmatprep.mubr.msk.f32.mxu0 %vm3219_vm0, %v3220_v1 }
 0xb4e   :  { %2934 = vmatprep.subr.bf16.mxu0 %v3218_v0 }
 0xb51   :  { %2936 = vmatpush3.bf16.msra.mxu0 %v3365_v33 }
 0xb52   :  { %2943 = vmatprep.subr.bf16.mxu0 %v3218_v0 }
 0xc17   :  { %v1071_v43 = vpop.f32.mrb[10].mxu0 }
 0xc18   :  { %v1146_v44 = vpop.f32.mrb[10].mxu1  ;;  %v2692_v45 = vpop.f32.mrb[11].mxu0 }
 0xc19   :  { %v1147_v46 = vadd.f32 %v1146_v44, %v1071_v43  ;;  %v2703_v47 = vpop.f32.mrb[11].mxu1 }
 0xc1b   :  { %v1150_v48 = vadd.f32 %v3398_v41, %v1147_v46 }
 0xc1d   :  { %3067 = vtanh.f32 %v1150_v48  ;;  %v2422_v55 = vmul.f32 -1.442695, %v1150_v48 }
 0xc1f   :  { %v1243_v50 = vpop.f32.mrb[12].mxu0 }
 0xc20   :  { %v1247_v51 = vadd.f32 %v1243_v50, %v1176_v49  ;;  %v2714_v52 = vpop.f32.mrb[13].mxu0 }
 0xc22   :  { %3069 = vtanh.f32 %v1247_v51  ;;  %v2424_v56 = vmul.f32 -1.442695, %v1247_v51 }
 0xc23   :  { %3071 = vpow2.f32 %v2422_v55 }
 0xc24   :  { %3073 = vpow2.f32 %v2424_v56 }
 0xc27   :  { %v3068_v53 = vpop.eup %3067 }
 0xc28   :  { %1160 = vrot.lane.b32.xlu0 %v3068_v53, %s3221_s1 }
 0xc2c   :  { %v3070_v54 = vpop.eup %3069 }
 0xc2d   :  { %1257 = vrot.lane.b32.xlu1 %v3070_v54, %s3221_s1  ;;  %v3072_v57 = vpop.eup %3071 }
 0xc2e   :  { %v1154_v58 = vadd.f32 1.0, %v3072_v57  ;;  %v3074_v59 = vpop.eup %3073 }
 0xc2f   :  { %v1251_v60 = vadd.f32 1.0, %v3074_v59 }
 0xc30   :  { %3075 = vrcp.f32 %v1154_v58 }
 0xc31   :  { %3077 = vrcp.f32 %v1251_v60 }
 0xc3a   :  { %v3076_v61 = vpop.eup %3075 }
 0xc3b   :  { %v3078_v2 = vpop.eup %3077  ;;  %v1158_v6 = vmul.f32 %v3076_v61, %v3482_v30 }
 0xc3c   :  { %v1255_v10 = vmul.f32 %v3078_v2, %v3484_v31 }
 0xc9a   :  { %v1161_v62 = vpop.permute.xlu0 %1160 }
 0xc9b   :  { %v1163_v63 = vmul.f32 %v3076_v61, %v1161_v62 }
 0xc9d   :  { %1165 = vrot.lane.b32.xlu0 %v1163_v63, %s3222_s26 }
 0xc9f   :  { %v1258_v3 = vpop.permute.xlu1 %1257 }
 0xca0   :  { %v1260_v4 = vmul.f32 %v3078_v2, %v1258_v3 }
 0xca2   :  { %1262 = vrot.lane.b32.xlu1 %v1260_v4, %s3222_s26 }
 0xd0f   :  { %v1166_v8 = vpop.permute.xlu0 %1165 }
 0xd10   :  { %v3519_v9 = vadd.f32 %v1166_v8, %v1158_v6 }
 0xd12   :  { %3079 = vtanh.f32 %v3519_v9 }
 0xd14   :  { %v1263_v11 = vpop.permute.xlu1 %1262 }
 0xd15   :  { %v3523_v12 = vadd.f32 %v1263_v11, %v1255_v10  ;;  %v1720_v10 = vld [vmem:[#allocation2 + $0x30] sm:$0xff] }
 0xd17   :  { %3081 = vtanh.f32 %v3523_v12 }
 0xd1c   :  { %v3080_v13 = vpop.eup %3079 }
 0xd1d   :  { %1171 = vrot.lane.b32.xlu0 %v3080_v13, %s3221_s1 }
 0xd21   :  { %v3082_v14 = vpop.eup %3081 }
 0xd22   :  { %1268 = vrot.lane.b32.xlu1 %v3082_v14, %s3221_s1 }
 0xd8f   :  { %v1172_v15 = vpop.permute.xlu0 %1171 }
 0xd90   :  { %v1174_v16 = vmul.f32 %v3076_v61, %v1172_v15 }
 0xd92   :  { %1273 = vrot.lane.b32.xlu0 %v1174_v16, %s3222_s26 }
 0xd94   :  { %v1269_v17 = vpop.permute.xlu1 %1268 }
 0xd95   :  { %v1271_v18 = vmul.f32 %v3078_v2, %v1269_v17 }
 0xd97   :  { %1348 = vrot.lane.b32.xlu1 %v1271_v18, %s3222_s26 }
 0xe04   :  { %v1274_v19 = vpop.permute.xlu0 %1273 }
 0xe05   :  { %2724 = vmatmul.mubr.msk.f32.vlgmr.msra.gmra.mrb[12].mxu1 %vm90_vm1, %v1274_v19 }
 0xe06   :  { %2939 = vmatpush3.bf16.msra.mxu1 %v3337_v5  ;;  %2745 = vmatprep.mubr.msk.f32.mxu1 %vm3219_vm0, %v3220_v1 }
 0xe07   :  { %2940 = vmatprep.subr.bf16.mxu1 %v3218_v0 }
 0xe09   :  { %v1349_v20 = vpop.permute.xlu1 %1348 }
 0xe0a   :  { %2942 = vmatpush3.bf16.msra.mxu1 %v3343_v7  ;;  %2735 = vmatmul.mubr.msk.f32.vlgmr.msra.gmra.mrb[14].mxu0 %vm90_vm1, %v1349_v20 }
 0xe0b   :  { %2945 = vmatpush3.bf16.msra.mxu0 %v3356_v25  ;;  %2949 = vmatprep.subr.bf16.mxu1 %v3218_v0 }
 0xe0c   :  { %2946 = vmatprep.subr.bf16.mxu0 %v3218_v0  ;;  %2756 = vmatprep.mubr.msk.f32.mxu0 %vm3219_vm0, %v3220_v1 }
 0xe0d   :  { %2746 = vmatmul.mubr.msk.f32.vlgmr.msra.gmra.mrb[14].mxu1 %vm90_vm1, %v1349_v20 }
 0xe0e   :  { %2951 = vmatpush3.bf16.msra.mxu1 %v3358_v29  ;;  %2767 = vmatprep.mubr.msk.f32.mxu1 %vm3219_vm0, %v3220_v1 }
 0xe0f   :  { %2948 = vmatpush3.bf16.msra.mxu0 %v3361_v32  ;;  %2952 = vmatprep.subr.bf16.mxu1 %v3218_v0 }
 0xe10   :  { %2955 = vmatprep.subr.bf16.mxu0 %v3218_v0 }
 0xe12   :  { %2954 = vmatpush3.bf16.msra.mxu1 %v3365_v33 }
 0xe13   :  { %2961 = vmatprep.subr.bf16.mxu1 %v3218_v0 }
 0xed8   :  { %v1343_v21 = vpop.f32.mrb[12].mxu1 }
 0xed9   :  { %v2725_v22 = vpop.f32.mrb[13].mxu1 }
 0xedd   :  { %v1418_v23 = vpop.f32.mrb[14].mxu0 }
 0xede   :  { %v1419_v24 = vadd.f32 %v1418_v23, %v1343_v21  ;;  %v2736_v26 = vpop.f32.mrb[15].mxu0 }
 0xee0   :  { %v1422_v28 = vadd.f32 %v3398_v41, %v1419_v24  ;;  %v1515_v30 = vpop.f32.mrb[14].mxu1 }
 0xee1   :  { %v1519_v31 = vadd.f32 %v1515_v30, %v1448_v27  ;;  %v2747_v34 = vpop.f32.mrb[15].mxu1 }
 0xee2   :  { %3083 = vtanh.f32 %v1422_v28  ;;  %v2427_v37 = vmul.f32 -1.442695, %v1422_v28 }
 0xee3   :  { %3085 = vtanh.f32 %v1519_v31  ;;  %v2429_v38 = vmul.f32 -1.442695, %v1519_v31 }
 0xee4   :  { %3087 = vpow2.f32 %v2427_v37 }
 0xee5   :  { %3089 = vpow2.f32 %v2429_v38 }
 0xeec   :  { %v3084_v35 = vpop.eup %3083 }
 0xeed   :  { %v3086_v36 = vpop.eup %3085  ;;  %1432 = vrot.lane.b32.xlu0 %v3084_v35, %s3221_s1 }
 0xeee   :  { %1529 = vrot.lane.b32.xlu1 %v3086_v36, %s3221_s1  ;;  %v3088_v39 = vpop.eup %3087 }
 0xeef   :  { %v3090_v40 = vpop.eup %3089  ;;  %v1426_v42 = vadd.f32 1.0, %v3088_v39 }
 0xef0   :  { %v1523_v43 = vadd.f32 1.0, %v3090_v40 }
 0xef1   :  { %3091 = vrcp.f32 %v1426_v42 }
 0xef2   :  { %3093 = vrcp.f32 %v1523_v43 }
 0xefb   :  { %v3092_v44 = vpop.eup %3091 }
 0xefc   :  { %v3094_v46 = vpop.eup %3093  ;;  %v1430_v50 = vmul.f32 %v3092_v44, %v3519_v9 }
 0xefd   :  { %v1527_v51 = vmul.f32 %v3094_v46, %v3523_v12 }
 0xf5f   :  { %v1433_v45 = vpop.permute.xlu0 %1432 }
 0xf60   :  { %v1530_v47 = vpop.permute.xlu1 %1529  ;;  %v1435_v48 = vmul.f32 %v3092_v44, %v1433_v45 }
 0xf61   :  { %v1532_v49 = vmul.f32 %v3094_v46, %v1530_v47 }
 0xf62   :  { %1437 = vrot.lane.b32.xlu0 %v1435_v48, %s3222_s26 }
 0xf63   :  { %1534 = vrot.lane.b32.xlu1 %v1532_v49, %s3222_s26  ;;  %v1992_v49 = vld [vmem:[#allocation2 + $0x38] sm:$0xff] }
 0xfd4   :  { %v1438_v52 = vpop.permute.xlu0 %1437 }
 0xfd5   :  { %v1535_v53 = vpop.permute.xlu1 %1534  ;;  %v3558_v54 = vadd.f32 %v1438_v52, %v1430_v50 }
 0xfd6   :  { %v3560_v55 = vadd.f32 %v1535_v53, %v1527_v51 }
 0xfd7   :  { %3095 = vtanh.f32 %v3558_v54 }
 0xfd8   :  { %3097 = vtanh.f32 %v3560_v55 }
 0xfe1   :  { %v3096_v56 = vpop.eup %3095 }
 0xfe2   :  { %v3098_v57 = vpop.eup %3097  ;;  %1443 = vrot.lane.b32.xlu0 %v3096_v56, %s3221_s1 }
 0xfe3   :  { %1540 = vrot.lane.b32.xlu1 %v3098_v57, %s3221_s1 }
0x1054   :  { %v1444_v58 = vpop.permute.xlu0 %1443 }
0x1055   :  { %v1541_v59 = vpop.permute.xlu1 %1540  ;;  %v1446_v60 = vmul.f32 %v3092_v44, %v1444_v58 }
0x1056   :  { %v1543_v61 = vmul.f32 %v3094_v46, %v1541_v59 }
0x1057   :  { %1545 = vrot.lane.b32.xlu0 %v1446_v60, %s3222_s26 }
0x1058   :  { %1620 = vrot.lane.b32.xlu1 %v1543_v61, %s3222_s26 }
0x10c9   :  { %v1546_v62 = vpop.permute.xlu0 %1545 }
0x10ca   :  { %v1621_v63 = vpop.permute.xlu1 %1620  ;;  %2757 = vmatmul.mubr.msk.f32.vlgmr.msra.gmra.mrb[16].mxu0 %vm90_vm1, %v1546_v62 }
0x10cb   :  { %2768 = vmatmul.mubr.msk.f32.vlgmr.msra.gmra.mrb[16].mxu1 %vm90_vm1, %v1621_v63  ;;  %2957 = vmatpush3.bf16.msra.mxu0 %v3337_v5 }
0x10cc   :  { %2958 = vmatprep.subr.bf16.mxu0 %v3218_v0  ;;  %2778 = vmatprep.mubr.msk.f32.mxu0 %vm3219_vm0, %v3220_v1 }
0x10cd   :  { %2963 = vmatpush3.bf16.msra.mxu1 %v3356_v25  ;;  %2789 = vmatprep.mubr.msk.f32.mxu1 %vm3219_vm0, %v3220_v1 }
0x10ce   :  { %2964 = vmatprep.subr.bf16.mxu1 %v3218_v0 }
0x10cf   :  { %2960 = vmatpush3.bf16.msra.mxu0 %v3343_v7 }
0x10d0   :  { %2967 = vmatprep.subr.bf16.mxu0 %v3218_v0 }
0x10d1   :  { %2966 = vmatpush3.bf16.msra.mxu1 %v3361_v32 }
0x10d2   :  { %2779 = vmatmul.mubr.msk.f32.vlgmr.msra.gmra.mrb[18].mxu0 %vm90_vm1, %v1621_v63  ;;  %2973 = vmatprep.subr.bf16.mxu1 %v3218_v0 }
0x10d3   :  { %2969 = vmatpush3.bf16.msra.mxu0 %v3358_v29  ;;  %2800 = vmatprep.mubr.msk.f32.mxu0 %vm3219_vm0, %v3220_v1 }
0x10d4   :  { %2970 = vmatprep.subr.bf16.mxu0 %v3218_v0 }
0x10d7   :  { %2972 = vmatpush3.bf16.msra.mxu0 %v3365_v33 }
0x10d8   :  { %2979 = vmatprep.subr.bf16.mxu0 %v3218_v0 }
0x119d   :  { %v1615_v2 = vpop.f32.mrb[16].mxu0 }
0x119e   :  { %v1690_v3 = vpop.f32.mrb[16].mxu1  ;;  %v2758_v4 = vpop.f32.mrb[17].mxu0 }
0x119f   :  { %v1691_v6 = vadd.f32 %v1690_v3, %v1615_v2  ;;  %v2769_v8 = vpop.f32.mrb[17].mxu1 }
0x11a1   :  { %v1694_v9 = vadd.f32 %v3398_v41, %v1691_v6 }
0x11a3   :  { %3099 = vtanh.f32 %v1694_v9  ;;  %v2432_v16 = vmul.f32 -1.442695, %v1694_v9 }
0x11a5   :  { %v1787_v11 = vpop.f32.mrb[18].mxu0 }
0x11a6   :  { %v1791_v12 = vadd.f32 %v1787_v11, %v1720_v10  ;;  %v2780_v13 = vpop.f32.mrb[19].mxu0 }
0x11a8   :  { %3101 = vtanh.f32 %v1791_v12  ;;  %v2434_v17 = vmul.f32 -1.442695, %v1791_v12 }
0x11a9   :  { %3103 = vpow2.f32 %v2432_v16 }
0x11aa   :  { %3105 = vpow2.f32 %v2434_v17 }
0x11ad   :  { %v3100_v14 = vpop.eup %3099 }
0x11ae   :  { %1704 = vrot.lane.b32.xlu0 %v3100_v14, %s3221_s1 }
0x11b2   :  { %v3102_v15 = vpop.eup %3101 }
0x11b3   :  { %1801 = vrot.lane.b32.xlu1 %v3102_v15, %s3221_s1  ;;  %v3104_v18 = vpop.eup %3103 }
0x11b4   :  { %v1698_v19 = vadd.f32 1.0, %v3104_v18  ;;  %v3106_v20 = vpop.eup %3105 }
0x11b5   :  { %v1795_v21 = vadd.f32 1.0, %v3106_v20 }
0x11b6   :  { %3107 = vrcp.f32 %v1698_v19 }
0x11b7   :  { %3109 = vrcp.f32 %v1795_v21 }
0x11c0   :  { %v3108_v22 = vpop.eup %3107 }
0x11c1   :  { %v3110_v26 = vpop.eup %3109  ;;  %v1702_v30 = vmul.f32 %v3108_v22, %v3558_v54 }
0x11c2   :  { %v1799_v35 = vmul.f32 %v3110_v26, %v3560_v55 }
0x1220   :  { %v1705_v23 = vpop.permute.xlu0 %1704 }
0x1221   :  { %v1707_v24 = vmul.f32 %v3108_v22, %v1705_v23 }
0x1223   :  { %1709 = vrot.lane.b32.xlu0 %v1707_v24, %s3222_s26 }
0x1225   :  { %v1802_v27 = vpop.permute.xlu1 %1801 }
0x1226   :  { %v1804_v28 = vmul.f32 %v3110_v26, %v1802_v27 }
0x1228   :  { %1806 = vrot.lane.b32.xlu1 %v1804_v28, %s3222_s26 }
0x1295   :  { %v1710_v31 = vpop.permute.xlu0 %1709 }
0x1296   :  { %v3595_v34 = vadd.f32 %v1710_v31, %v1702_v30 }
0x1298   :  { %3111 = vtanh.f32 %v3595_v34 }
0x129a   :  { %v1807_v36 = vpop.permute.xlu1 %1806 }
0x129b   :  { %v3599_v37 = vadd.f32 %v1807_v36, %v1799_v35 }
0x129d   :  { %3113 = vtanh.f32 %v3599_v37 }
0x12a2   :  { %v3112_v38 = vpop.eup %3111 }
0x12a3   :  { %1715 = vrot.lane.b32.xlu0 %v3112_v38, %s3221_s1  ;;  %v2264_v38 = vld [vmem:[%s3674_s5 + $0x8] sm:$0xff] }
0x12a7   :  { %v3114_v39 = vpop.eup %3113 }
0x12a8   :  { %1812 = vrot.lane.b32.xlu1 %v3114_v39, %s3221_s1  ;;  %v2265_v39 = vld [vmem:[%s3674_s5 + $0x10] sm:$0xff] }
0x1315   :  { %v1716_v40 = vpop.permute.xlu0 %1715 }
0x1316   :  { %v1718_v42 = vmul.f32 %v3108_v22, %v1716_v40 }
0x1318   :  { %1817 = vrot.lane.b32.xlu0 %v1718_v42, %s3222_s26  ;;  %v2266_v42 = vld [vmem:[%s3674_s5 + $0x18] sm:$0xff] }
0x131a   :  { %v1813_v43 = vpop.permute.xlu1 %1812 }
0x131b   :  { %v1815_v44 = vmul.f32 %v3110_v26, %v1813_v43  ;;  %v2995_v43 = vpack.c.bf16 %v2266_v42, %v2265_v39 }
0x131d   :  { %1892 = vrot.lane.b32.xlu1 %v1815_v44, %s3222_s26  ;;  %v2349_v44 = vld [vmem:[%s3676_s7] sm:$0xff] }
0x138a   :  { %v1818_v45 = vpop.permute.xlu0 %1817 }
0x138b   :  { %2790 = vmatmul.mubr.msk.f32.vlgmr.msra.gmra.mrb[18].mxu1 %vm90_vm1, %v1818_v45  ;;  %v2445_v45 = vadd.f32 -0.5, %v2349_v44 }
0x138c   :  { %2975 = vmatpush3.bf16.msra.mxu1 %v3337_v5  ;;  %2811 = vmatprep.mubr.msk.f32.mxu1 %vm3219_vm0, %v3220_v1 }
0x138d   :  { %2976 = vmatprep.subr.bf16.mxu1 %v3218_v0 }
0x138f   :  { %v1893_v46 = vpop.permute.xlu1 %1892 }
0x1390   :  { %2978 = vmatpush3.bf16.msra.mxu1 %v3343_v7  ;;  %2801 = vmatmul.mubr.msk.f32.vlgmr.msra.gmra.mrb[20].mxu0 %vm90_vm1, %v1893_v46 }
0x1391   :  { %2985 = vmatprep.subr.bf16.mxu1 %v3218_v0  ;;  %2981 = vmatpush3.bf16.msra.mxu0 %v3356_v25 }
0x1392   :  { %2982 = vmatprep.subr.bf16.mxu0 %v3218_v0  ;;  %2822 = vmatprep.mubr.msk.f32.mxu0 %vm3219_vm0, %v3220_v1 }
0x1393   :  { %2812 = vmatmul.mubr.msk.f32.vlgmr.msra.gmra.mrb[20].mxu1 %vm90_vm1, %v1893_v46 }
0x1394   :  { %2987 = vmatpush3.bf16.msra.mxu1 %v3358_v29  ;;  %2833 = vmatprep.mubr.msk.f32.mxu1 %vm3219_vm0, %v3220_v1 }
0x1395   :  { %2988 = vmatprep.subr.bf16.mxu1 %v3218_v0  ;;  %2984 = vmatpush3.bf16.msra.mxu0 %v3361_v32 }
0x1396   :  { %2991 = vmatprep.subr.bf16.mxu0 %v3218_v0 }
0x1398   :  { %2990 = vmatpush3.bf16.msra.mxu1 %v3365_v33 }
0x145e   :  { %v1887_v5 = vpop.f32.mrb[18].mxu1 }
0x145f   :  { %v2791_v7 = vpop.f32.mrb[19].mxu1 }
0x1460   :  { %v3224_v7 = vmov 0  }
0x1461   :  { %3009 = vset.pattern.permute.xlu0 %v3224_v7  ;;  %3010 = vset.pattern.permute.xlu1 %v3224_v7 }
0x1463   :  { %v1962_v25 = vpop.f32.mrb[20].mxu0 }
0x1464   :  { %v1963_v47 = vadd.f32 %v1962_v25, %v1887_v5  ;;  %v2802_v48 = vpop.f32.mrb[21].mxu0  ;;  %v2359_v5 = vmul.f32 7.5, %v2445_v45 }
0x1465   :  { %v2358_v48 = vmul.f32 15.0, %v2445_v45 }
0x1466   :  { %v1966_v50 = vadd.f32 %v3398_v41, %v1963_v47  ;;  %v2059_v29 = vpop.f32.mrb[20].mxu1 }
0x1467   :  { %v2063_v51 = vadd.f32 %v2059_v29, %v1992_v49  ;;  %v2813_v52 = vpop.f32.mrb[21].mxu1 }
0x1468   :  { %3115 = vtanh.f32 %v1966_v50  ;;  %v2437_v32 = vmul.f32 -1.442695, %v1966_v50 }
0x1469   :  { %3117 = vtanh.f32 %v2063_v51  ;;  %v2439_v33 = vmul.f32 -1.442695, %v2063_v51  ;;  %v2351_v51 = vmul.f32 20.0, %v2445_v45 }
0x146a   :  { %3119 = vpow2.f32 %v2437_v32 }
0x146b   :  { %3121 = vpow2.f32 %v2439_v33 }
0x1472   :  { %v3116_v53 = vpop.eup %3115 }
0x1473   :  { %v3118_v54 = vpop.eup %3117  ;;  %1976 = vrot.lane.b32.xlu0 %v3116_v53, %s3221_s1 }
0x1474   :  { %2073 = vrot.lane.b32.xlu1 %v3118_v54, %s3221_s1  ;;  %v3120_v55 = vpop.eup %3119  ;;  %v2443_v54 = vld [vmem:[%s3675_s6] ss:$0 sm:$0xff] }
0x1475   :  { %v3122_v56 = vpop.eup %3121  ;;  %v1970_v57 = vadd.f32 1.0, %v3120_v55 }
0x1476   :  { %v2067_v58 = vadd.f32 1.0, %v3122_v56 }
0x1477   :  { %3123 = vrcp.f32 %v1970_v57 }
0x1478   :  { %3125 = vrcp.f32 %v2067_v58 }
0x1481   :  { %v3124_v59 = vpop.eup %3123 }
0x1482   :  { %v3126_v61 = vpop.eup %3125  ;;  %v1974_v3 = vmul.f32 %v3124_v59, %v3595_v34 }
0x1483   :  { %v2071_v4 = vmul.f32 %v3126_v61, %v3599_v37 }
0x14e5   :  { %v1977_v60 = vpop.permute.xlu0 %1976 }
0x14e6   :  { %v2074_v62 = vpop.permute.xlu1 %2073  ;;  %v1979_v63 = vmul.f32 %v3124_v59, %v1977_v60 }
0x14e7   :  { %v2076_v2 = vmul.f32 %v3126_v61, %v2074_v62 }
0x14e8   :  { %1981 = vrot.lane.b32.xlu0 %v1979_v63, %s3222_s26 }
0x14e9   :  { %2078 = vrot.lane.b32.xlu1 %v2076_v2, %s3222_s26 }
0x155a   :  { %v1982_v6 = vpop.permute.xlu0 %1981 }
0x155b   :  { %v2079_v8 = vpop.permute.xlu1 %2078  ;;  %v1984_v9 = vadd.f32 %v1982_v6, %v1974_v3 }
0x155c   :  { %v2081_v10 = vadd.f32 %v2079_v8, %v2071_v4 }
0x155d   :  { %3127 = vtanh.f32 %v1984_v9 }
0x155e   :  { %3129 = vtanh.f32 %v2081_v10 }
0x1567   :  { %v3128_v11 = vpop.eup %3127 }
0x1568   :  { %v3130_v12 = vpop.eup %3129  ;;  %1987 = vrot.lane.b32.xlu0 %v3128_v11, %s3221_s1 }
0x1569   :  { %2084 = vrot.lane.b32.xlu1 %v3130_v12, %s3221_s1 }
0x15da   :  { %v1988_v13 = vpop.permute.xlu0 %1987 }
0x15db   :  { %v2085_v14 = vpop.permute.xlu1 %2084  ;;  %v1990_v15 = vmul.f32 %v3124_v59, %v1988_v13  ;;  %v2390_v59 = vlaneseq }
0x15dc   :  { %v2087_v16 = vmul.f32 %v3126_v61, %v2085_v14 }
0x15dd   :  { %2089 = vrot.lane.b32.xlu0 %v1990_v15, %s3222_s26  ;;  %v2391_v2 = vand.u32 127, %v2390_v59 }
0x15de   :  { %2164 = vrot.lane.b32.xlu1 %v2087_v16, %s3222_s26 }
0x15df   :  { %vm2393_vm2 = vcmp.eq.s32.totalorder %v2391_v2, 1  ;;  %vm2392_vm3 = vcmp.eq.s32.totalorder %v2391_v2, 0 }
0x164f   :  { %v2090_v17 = vpop.permute.xlu0 %2089 }
0x1650   :  { %v2165_v18 = vpop.permute.xlu1 %2164  ;;  %2823 = vmatmul.mubr.msk.f32.vlgmr.msra.gmra.mrb[22].mxu0 %vm90_vm1, %v2090_v17 }
0x1651   :  { %2834 = vmatmul.mubr.msk.f32.vlgmr.msra.gmra.mrb[22].mxu1 %vm90_vm1, %v2165_v18  ;;  %2844 = vmatprep.mubr.msk.f32.mxu0 %vm3219_vm0, %v3220_v1 }
0x1723   :  { %v2159_v19 = vpop.f32.mrb[22].mxu0 }
0x1724   :  { %v2234_v20 = vpop.f32.mrb[22].mxu1  ;;  %v2824_v21 = vpop.f32.mrb[23].mxu0 }
0x1725   :  { %v2235_v22 = vadd.f32 %v2234_v20, %v2159_v19  ;;  %v2835_v23 = vpop.f32.mrb[23].mxu1 }
0x1727   :  { %v2238_v24 = vadd.f32 %v3398_v41, %v2235_v22  ;;  %v2263_v41 = vld [vmem:[%s3674_s5] sm:$0xff] }
0x1728   :  { %v2992_v40 = vpack.c.bf16 %v2264_v38, %v2263_v41 }
0x1729   :  { %3131 = vtanh.f32 %v2238_v24  ;;  %v2442_v27 = vmul.f32 -1.442695, %v2238_v24 }
0x172a   :  { %2993 = vmatpush3.bf16.msra.mxu0 %v2992_v40 }
0x172b   :  { %3133 = vpow2.f32 %v2442_v27  ;;  %2994 = vmatprep.subr.bf16.mxu0 %v3218_v0  ;;  %v2352_v0 = vmul.f32 10.0, %v2445_v45 }
0x172e   :  { %2996 = vmatpush3.bf16.msra.mxu0 %v2995_v43 }
0x1733   :  { %v3132_v26 = vpop.eup %3131 }
0x1734   :  { %2248 = vrot.lane.b32.xlu0 %v3132_v26, %s3221_s1 }
0x1735   :  { %v3134_v28 = vpop.eup %3133 }
0x1736   :  { %v2242_v30 = vadd.f32 1.0, %v3134_v28 }
0x1738   :  { %3135 = vrcp.f32 %v2242_v30 }
0x1742   :  { %v3136_v31 = vpop.eup %3135 }
0x1743   :  { %v2246_v1 = vmul.f32 %v3136_v31, %v1984_v9 }
0x17a6   :  { %v2249_v34 = vpop.permute.xlu0 %2248 }
0x17a7   :  { %v2251_v35 = vmul.f32 %v3136_v31, %v2249_v34 }
0x17a9   :  { %2253 = vrot.lane.b32.xlu1 %v2251_v35, %s3222_s26 }
0x181b   :  { %v2254_v36 = vpop.permute.xlu1 %2253 }
0x181c   :  { %v2256_v37 = vadd.f32 %v2254_v36, %v2246_v1 }
0x181e   :  { %3137 = vtanh.f32 %v2256_v37 }
0x1828   :  { %v3138_v46 = vpop.eup %3137 }
0x1829   :  { %2259 = vrot.lane.b32.xlu0 %v3138_v46, %s3221_s1 }
0x182d   :  { %2361 = vrot.lane.b32.xlu0 %v2359_v5, %s3223_s16 }
0x189b   :  { %v2260_v25 = vpop.permute.xlu0 %2259 }
0x189c   :  { %v2262_v47 = vmul.f32 %v3136_v31, %v2260_v25 }
0x189e   :  { %2275 = vrot.lane.b32.xlu1 %v2262_v47, %s3222_s26 }
0x189f   :  { %v2362_v49 = vpop.permute.xlu0 %2361 }
0x18a0   :  { %v2364_v50 = vadd.f32 %v2362_v49, %v2358_v48 }
0x18a2   :  { %2354 = vrot.lane.b32.xlu1 %v2352_v0, %s3223_s16  ;;  %2384 = vperm.xlu0 %3009, %v2364_v50  }
0x1910   :  { %v2276_v29 = vpop.permute.xlu1 %2275 }
0x1911   :  { %2845 = vmatmul.mubr.msk.f32.vlgmr.msra.gmra.mrb[24].mxu0 %vm90_vm1, %v2276_v29 }
0x1914   :  { %v2355_v52 = vpop.permute.xlu1 %2354 }
0x1915   :  { %v2357_v53 = vadd.f32 %v2355_v52, %v2351_v51 }
0x1917   :  { %2375 = vperm.xlu1 %3010, %v2357_v53  }
0x1921   :  { %v2385_v61 = vpop.permute.xlu0 %2384 }
0x1996   :  { %v2376_v3 = vpop.permute.xlu1 %2375 }
0x19e4   :  { %v2345_v32 = vpop.f32.mrb[24].mxu0 }
0x19e5   :  { %v2346_v33 = vadd.f32 %v2443_v54, %v2345_v32  ;;  %v2846_v55 = vpop.f32.mrb[25].mxu0 }
0x19e7   :  { %v2446_v56 = vmul.f32 -1.442695, %v2346_v33 }
0x19e9   :  { %3139 = vpow2.f32 %v2446_v56 }
0x19f3   :  { %v3140_v57 = vpop.eup %3139 }
0x19f4   :  { %v2368_v58 = vadd.f32 1.0, %v3140_v57 }
0x19f6   :  { %3141 = vrcp.f32 %v2368_v58 }
0x1a00   :  { %v3142_v60 = vpop.eup %3141 }
0x1a01   :  { %v2381_v62 = vmul.f32 40.0, %v3142_v60  ;;  %v2371_v63 = vmul.f32 80.0, %v3142_v60 }
0x1a03   :  { %v2387_v4 = vadd.f32 %v2385_v61, %v2381_v62  ;;  %v2372_v6 = vadd.f32 100.0, %v2371_v63 }
0x1a05   :  { %v2388_v8 = vmax.f32 %v2387_v4, 0.0  ;;  %v2378_v9 = vadd.f32 %v2376_v3, %v2372_v6 }
0x1a07   :  { %v2389_v10 = vmin.f32 %v2388_v8, 40.0  ;;  %v2379_v11 = vmax.f32 %v2378_v9, 100.0 }
0x1a09   :  { %v2394_v12 = vsel %vm2393_vm2, %v2389_v10, %v2346_v33  ;;  %v2380_v13 = vmin.f32 %v2379_v11, 180.0 }
0x1a0b   :  { %v2395_v14 = vsel %vm2392_vm3, %v2380_v13, %v2394_v12 }
0x1a0c   :  { %2397 = vst.msk [vmem:[%s3677_s8] sm:$0xff] %vm2396_vm4, %v2395_v14 }
0x1a0d   :  { %2402 = vsyncpa [#allocation3], 1 }
0x1a0e   :  { %2403 = vsyncpa [#allocation5], 1 }

</bundles_post_ra>
